<compile_context>
chip_gen: v5e
topology: v5e:2x2
jax: 0.10.0
libtpu: 0.0.40
codegen_flags: <defaults>
</compile_context>

<pallas_src>
import functools

import numpy as np
import jax
import jax.numpy as jnp
from jax import lax
from jax.experimental import pallas as pl
from jax.experimental.pallas import tpu as pltpu

_I32_MIN = np.iinfo(np.int32).min   # sentinel for padded batch rows
_I32_MAX = np.iinfo(np.int32).max   # sentinel for padded / unused class slots


def _round_up(x, m):
  return (x + m - 1) // m * m


def _normalize_f32(z):
  # F.normalize(x): x / max(||x||_2, 1e-12) == x * rsqrt(max(||x||^2, 1e-24))
  z = z.astype(jnp.float32)
  sq = jnp.sum(z * z, axis=-1, keepdims=True)
  return z * lax.rsqrt(jnp.maximum(sq, 1e-24))


def _protoclr_kernel(uniq_col_ref, uniq_row_ref, y_row_ref, y_col_ref,
                     scale_col_ref, logvalid_ref, z1_ref, z2_ref, out_ref,
                     proto_f32, proto_bf16, acc_ref,
                     *, batch, tile_m):
  phase = pl.program_id(0)          # 0: accumulate prototypes, 1: loss
  tile = pl.program_id(1)           # row tile over the (padded) batch
  num_tiles = pl.num_programs(1)
  off = pl.multiple_of(tile * tile_m, tile_m)   # global row offset of this tile

  @pl.when((phase == 0) & (tile == 0))
  def _init():
    proto_f32[...] = jnp.zeros_like(proto_f32)
    acc_ref[...] = jnp.zeros_like(acc_ref)

  @pl.when(phase == 0)
  def _accumulate_prototypes():
    # Pre-transposed one-hot: rows = class slots, cols = this tile's samples
    # (the MXU contraction axis, lane-dense on the lhs).  Padded batch rows
    # carry INT32_MIN and padded class slots INT32_MAX, so no extra masking is
    # needed: sentinels never match real data.
    same = uniq_col_ref[...] == y_row_ref[...]                     # [Cp, TM]
    # Both views normalized then summed; the f32 normalized tiles die here.
    zs = (_normalize_f32(z1_ref[...]) + _normalize_f32(z2_ref[...])
          ).astype(jnp.bfloat16)                                   # [TM, DP]
    proto_f32[...] += lax.dot_general(
        same.astype(jnp.bfloat16), zs,
        dimension_numbers=(((1,), (0,)), ((), ())),
        preferred_element_type=jnp.float32)                        # [Cp, DP]

  @pl.when(phase == 1)
  def _loss():
    @pl.when(tile == 0)
    def _finalize_prototypes():
      # z_mean with 1/(2*count) (each sample contributes both views) and 1/tau
      # folded in once; result cast to the bf16 MXU operand.
      proto_bf16[...] = (proto_f32[...] * scale_col_ref[...]
                         ).astype(jnp.bfloat16)

    pb = proto_bf16[...]                                           # [Cp, DP]
    logvalid = logvalid_ref[...]                                   # [1, Cp]
    # Per-row one-hot over classes (for target-logit selection).
    nt = (y_col_ref[...] == uniq_row_ref[...]).astype(jnp.float32)  # [TM, Cp]

    def view_loss(z_raw):
      zn = _normalize_f32(z_raw)                                   # [TM, DP]
      # logits[i, c] = zn_i . z_mean_c / tau   (tau/count folded into pb).
      s = lax.dot_general(
          zn.astype(jnp.bfloat16), pb,
          dimension_numbers=(((1,), (1,)), ((), ())),
          preferred_element_type=jnp.float32)                      # [TM, Cp]
      # Target logit, selected from the same bf16 logits as the denominator.
      tgt = jnp.sum(s * nt, axis=-1, keepdims=True)                # [TM, 1]
      # Mask padded / unused class slots out of the softmax via a log bias,
      # then a plain lane-reduce log-sum-exp (no N=1 matmul).
      sb = s + logvalid
      m = jnp.max(sb, axis=-1, keepdims=True)                      # [TM, 1]
      denom = jnp.sum(jnp.exp(sb - m), axis=-1, keepdims=True)     # [TM, 1]
      return (m + jnp.log(denom)) - tgt

    per_row = view_loss(z1_ref[...]) + view_loss(z2_ref[...])      # [TM, 1]
    row_ids = lax.broadcasted_iota(jnp.int32, (tile_m, 1), 0) + off
    per_row = jnp.where(row_ids < batch, per_row, 0.0)
    acc_ref[...] += jnp.sum(per_row, axis=0, keepdims=True)        # [1, 1]

    @pl.when(tile == num_tiles - 1)
    def _write_out():
      # Mean over the 2B rows (both views).
      out_ref[...] = acc_ref[...] * (1.0 / (2.0 * batch))


def _layout_bytes(shape, dtype):
  """Conservative (8,128)-padded VMEM footprint estimate for a 2D buffer."""
  r = _round_up(shape[-2] if len(shape) >= 2 else 1, 8)
  c = _round_up(shape[-1], 128)
  return r * c * np.dtype(dtype).itemsize


@functools.partial(jax.jit, static_argnames=("tau", "tile_m", "max_classes"))
def protoclr_loss(z1, z2, y, *, tau, tile_m=256, max_classes=None):
  """Pallas TPU implementation of ProtoCLRLoss.forward(z1, z2, y).

  max_classes: static upper bound on the number of distinct labels in `y`
    (must be >= the true count). Defaults to the batch size (always safe).
  """
  b, d = z1.shape
  assert z2.shape == (b, d) and y.shape == (b,)

  # Row-tile size: multiple of 128, no larger than the padded batch.
  tile_m = min(tile_m, _round_up(b, 128))
  bp = _round_up(b, tile_m)                 # padded sample/row axis
  dp = _round_up(d, 128)                    # padded feature axis
  c_max = b if max_classes is None else min(int(max_classes), b)
  c_pad = _round_up(max(c_max, 1), 128)     # padded class axis (logit lanes)
  num_tiles = bp // tile_m

  # ---- Tiny on-device label bookkeeping (O(B*C), fully jittable). ----------
  y32 = y.astype(jnp.int32)
  # Sorted unique labels, padded with INT32_MAX.  NOTE: a real label equal to
  # INT32_MAX would alias with the class-padding sentinel (vanishingly
  # unlikely; documented limitation).
  uniq = jnp.unique(y32, size=c_pad, fill_value=jnp.int32(_I32_MAX))
  cnt = jnp.sum((uniq[:, None] == y32[None, :]).astype(jnp.float32), axis=1)
  scale = 0.5 / (tau * jnp.maximum(cnt, 1.0))            # folds 1/(2*cnt*tau)
  logvalid = jnp.where(cnt > 0.0, 0.0, -1e30).astype(jnp.float32)

  uniq_col = uniq.reshape(c_pad, 1)
  uniq_row = uniq.reshape(1, c_pad)
  scale_col = scale.reshape(c_pad, 1)
  logvalid_row = logvalid.reshape(1, c_pad)

  # ---- Padded / bf16-streamed sample inputs. -------------------------------
  pad_rows, pad_cols = bp - b, dp - d
  z1p = jnp.pad(z1.astype(jnp.float32), ((0, pad_rows), (0, pad_cols))
                ).astype(jnp.bfloat16)
  z2p = jnp.pad(z2.astype(jnp.float32), ((0, pad_rows), (0, pad_cols))
                ).astype(jnp.bfloat16)
  y_pad = jnp.pad(y32, (0, pad_rows), constant_values=jnp.int32(_I32_MIN))
  y_row = y_pad.reshape(1, bp)
  y_col = y_pad.reshape(bp, 1)

  # ---- VMEM budget (scratch + double-buffered blocks), with headroom. ------
  block_bytes = (
      2 * _layout_bytes((tile_m, dp), jnp.bfloat16)      # z1, z2 tiles
      + _layout_bytes((1, tile_m), jnp.int32)            # y_row tile
      + _layout_bytes((tile_m, 1), jnp.int32)            # y_col tile
      + 2 * _layout_bytes((c_pad, 1), jnp.float32)       # uniq_col, scale_col
      + 2 * _layout_bytes((1, c_pad), jnp.float32)       # uniq_row, logvalid
      + _layout_bytes((1, 1), jnp.float32))              # output
  scratch_bytes = (_layout_bytes((c_pad, dp), jnp.float32)
                   + _layout_bytes((c_pad, dp), jnp.bfloat16)
                   + _layout_bytes((1, 1), jnp.float32))
  needed = 2 * block_bytes + scratch_bytes               # x2 for double buffers
  vmem_limit = max(32 << 20, min(int(needed * 1.4) + (2 << 20), 96 << 20))

  kernel = functools.partial(_protoclr_kernel, batch=b, tile_m=tile_m)

  out = pl.pallas_call(
      kernel,
      out_shape=jax.ShapeDtypeStruct((1, 1), jnp.float32),
      grid_spec=pltpu.PrefetchScalarGridSpec(
          num_scalar_prefetch=0,
          grid=(2, num_tiles),     # (phase, row tile); phase is the outer loop
          in_specs=[
              pl.BlockSpec((c_pad, 1), lambda p, t: (0, 0)),      # uniq (col)
              pl.BlockSpec((1, c_pad), lambda p, t: (0, 0)),      # uniq (row)
              pl.BlockSpec((1, tile_m), lambda p, t: (0, t)),     # labels (row)
              pl.BlockSpec((tile_m, 1), lambda p, t: (t, 0)),     # labels (col)
              pl.BlockSpec((c_pad, 1), lambda p, t: (0, 0)),      # proto scale
              pl.BlockSpec((1, c_pad), lambda p, t: (0, 0)),      # log valid
              pl.BlockSpec((tile_m, dp), lambda p, t: (t, 0)),    # z1 tile
              pl.BlockSpec((tile_m, dp), lambda p, t: (t, 0)),    # z2 tile
          ],
          out_specs=pl.BlockSpec((1, 1), lambda p, t: (0, 0)),
          scratch_shapes=[
              pltpu.VMEM((c_pad, dp), jnp.float32),   # prototypes (f32 master)
              pltpu.VMEM((c_pad, dp), jnp.bfloat16),  # prototypes (MXU operand)
              pltpu.VMEM((1, 1), jnp.float32),        # scalar loss accumulator
          ]),
      compiler_params=pltpu.CompilerParams(
          # Both grid axes carry scratch state across iterations -> arbitrary.
          dimension_semantics=("arbitrary", "arbitrary"),
          vmem_limit_bytes=vmem_limit),
  )(uniq_col, uniq_row, y_row, y_col, scale_col, logvalid_row, z1p, z2p)
  return out[0, 0]


def _reference_loss(z1, z2, y, tau):
  """Host NumPy (f64) reference mirroring the PyTorch forward exactly."""
  y2 = np.concatenate([np.asarray(y), np.asarray(y)], axis=0)
  uniq = np.unique(y2)
  mapped = np.searchsorted(uniq, y2)
  c = uniq.shape[0]

  def normalize(x):
    n = np.sqrt(np.sum(x * x, axis=-1, keepdims=True))
    return x / np.maximum(n, 1e-12)

  z1 = np.asarray(z1, dtype=np.float64)
  z2 = np.asarray(z2, dtype=np.float64)
  z = np.concatenate([normalize(z1), normalize(z2)], axis=0)
  one_hot = np.eye(c)[mapped]
  counts = one_hot.sum(axis=0)
  z_mean = (one_hot.T @ z) / counts[:, None]
  logits = (z @ z_mean.T) / tau
  m = logits.max(axis=-1, keepdims=True)
  lse = (m + np.log(np.exp(logits - m).sum(axis=-1, keepdims=True)))[:, 0]
  nll = lse - logits[np.arange(logits.shape[0]), mapped]
  return float(nll.mean())


if __name__ == "__main__":
  key = jax.random.PRNGKey(0)

  configs = [
      # Small shapes consistent with the module: batch=8, feature=32, 4 labels.
      dict(b=8, d=32, n_labels=4, tau=0.5, max_classes=4),
      # Odd shapes + default (safe) max_classes path.
      dict(b=160, d=50, n_labels=5, tau=0.7, max_classes=None),
      # Multi-tile row streaming (bp=512, two tiles), padded feature axis.
      dict(b=300, d=200, n_labels=7, tau=0.3, max_classes=16),
  ]

  for cfg in configs:
    key, k1, k2, k3 = jax.random.split(key, 4)
    z1 = jax.random.normal(k1, (cfg["b"], cfg["d"]), dtype=jnp.float32)
    z2 = jax.random.normal(k2, (cfg["b"], cfg["d"]), dtype=jnp.float32)
    y = jax.random.randint(k3, (cfg["b"],), 0, cfg["n_labels"],
                           dtype=jnp.int32)

    loss = jax.block_until_ready(
        protoclr_loss(z1, z2, y, tau=cfg["tau"],
                      max_classes=cfg["max_classes"]))
    ref = _reference_loss(z1, z2, y, cfg["tau"])
    # bf16 input streaming + bf16 MXU operands (f32 accumulation / elementwise)
    # loosen agreement vs. the f64 reference slightly.
    np.testing.assert_allclose(np.asarray(loss), ref, rtol=3e-2, atol=3e-2)

  print("KERNEL_OK")
</pallas_src>

<mosaic_0001>
module attributes {stable_mosaic.version = 11 : i64} {
  func.func @_protoclr_kernel(%arg0: i32, %arg1: i32, %arg2: memref<128x1xi32, #tpu.memory_space<vmem>>, %arg3: memref<1x128xi32, #tpu.memory_space<vmem>>, %arg4: memref<1x128xi32, #tpu.memory_space<vmem>>, %arg5: memref<128x1xi32, #tpu.memory_space<vmem>>, %arg6: memref<128x1xf32, #tpu.memory_space<vmem>>, %arg7: memref<1x128xf32, #tpu.memory_space<vmem>>, %arg8: memref<128x128xbf16, #tpu.memory_space<vmem>>, %arg9: memref<128x128xbf16, #tpu.memory_space<vmem>>, %arg10: memref<1x1xf32, #tpu.memory_space<vmem>>, %arg11: memref<128x128xf32, #tpu.memory_space<vmem>>, %arg12: memref<128x128xbf16, #tpu.memory_space<vmem>>, %arg13: memref<1x1xf32, #tpu.memory_space<vmem>>) attributes {dimension_semantics = [#tpu.dimension_semantics<arbitrary>, #tpu.dimension_semantics<arbitrary>], iteration_bounds = array<i64: 2, 1>, scalar_prefetch = 0 : i64, scratch_operands = 3 : i64, tpu.core_type = #tpu.core_type<tc>, window_params = [{pipeline_mode = #tpu.pipeline_mode<synchronous>, transform_indices = @transform_0, window_bounds = array<i64: 128, 1>}, {pipeline_mode = #tpu.pipeline_mode<synchronous>, transform_indices = @transform_1, window_bounds = array<i64: 1, 128>}, {transform_indices = @transform_2, window_bounds = array<i64: 1, 128>}, {transform_indices = @transform_3, window_bounds = array<i64: 128, 1>}, {pipeline_mode = #tpu.pipeline_mode<synchronous>, transform_indices = @transform_4, window_bounds = array<i64: 128, 1>}, {pipeline_mode = #tpu.pipeline_mode<synchronous>, transform_indices = @transform_5, window_bounds = array<i64: 1, 128>}, {transform_indices = @transform_6, window_bounds = array<i64: 128, 128>}, {transform_indices = @transform_7, window_bounds = array<i64: 128, 128>}, {pipeline_mode = #tpu.pipeline_mode<synchronous>, transform_indices = @transform_8, window_bounds = array<i64: 1, 1>}]} {
    %c128_i32 = arith.constant 128 : i32
    %0 = arith.muli %arg1, %c128_i32 : i32
    %1 = tpu.assume_multiple %0, 128 : i32
    %c0_i32 = arith.constant 0 : i32
    %2 = arith.cmpi eq, %arg0, %c0_i32 : i32
    %c0_i32_0 = arith.constant 0 : i32
    %3 = arith.cmpi eq, %arg1, %c0_i32_0 : i32
    %4 = arith.andi %2, %3 : i1
    %5 = arith.extui %4 : i1 to i32
    %c0_i32_1 = arith.constant 0 : i32
    %6 = arith.cmpi ne, %5, %c0_i32_1 : i32
    scf.if %6 {
      %cst = arith.constant 0.000000e+00 : f32
      %13 = vector.broadcast %cst : f32 to vector<128x128xf32>
      %c0 = arith.constant 0 : index
      %c0_5 = arith.constant 0 : index
      %14 = vector.load %arg11[%c0, %c0_5] : memref<128x128xf32, #tpu.memory_space<vmem>>, vector<128x128xf32>
      tpu.vector_store %arg11[%c0, %c0_5], %13 {strides = array<i32>} : memref<128x128xf32, #tpu.memory_space<vmem>>, vector<128x128xf32>,
      %cst_6 = arith.constant 0.000000e+00 : f32
      %15 = vector.broadcast %cst_6 : f32 to vector<1x1xf32>
      %c0_7 = arith.constant 0 : index
      %c0_8 = arith.constant 0 : index
      %16 = vector.load %arg13[%c0_7, %c0_8] : memref<1x1xf32, #tpu.memory_space<vmem>>, vector<1x1xf32>
      tpu.vector_store %arg13[%c0_7, %c0_8], %15 {strides = array<i32>} : memref<1x1xf32, #tpu.memory_space<vmem>>, vector<1x1xf32>,
    } else {
    }
    %c0_i32_2 = arith.constant 0 : i32
    %7 = arith.cmpi eq, %arg0, %c0_i32_2 : i32
    %8 = arith.extui %7 : i1 to i32
    %c0_i32_3 = arith.constant 0 : i32
    %9 = arith.cmpi ne, %8, %c0_i32_3 : i32
    scf.if %9 {
      %c0 = arith.constant 0 : index
      %c0_5 = arith.constant 0 : index
      %13 = vector.load %arg2[%c0, %c0_5] : memref<128x1xi32, #tpu.memory_space<vmem>>, vector<128x1xi32>
      %c0_6 = arith.constant 0 : index
      %c0_7 = arith.constant 0 : index
      %14 = vector.load %arg4[%c0_6, %c0_7] : memref<1x128xi32, #tpu.memory_space<vmem>>, vector<1x128xi32>
      %15 = vector.broadcast %13 : vector<128x1xi32> to vector<128x128xi32>
      %16 = vector.broadcast %14 : vector<1x128xi32> to vector<128x128xi32>
      %17 = arith.cmpi eq, %15, %16 : vector<128x128xi32>
      %c0_8 = arith.constant 0 : index
      %c0_9 = arith.constant 0 : index
      %18 = vector.load %arg8[%c0_8, %c0_9] : memref<128x128xbf16, #tpu.memory_space<vmem>>, vector<128x128xbf16>
      %19 = arith.extf %18 : vector<128x128xbf16> to vector<128x128xf32>
      %20 = arith.mulf %19, %19 : vector<128x128xf32>
      %cst = arith.constant dense<0.000000e+00> : vector<128xf32>
      %21 = vector.multi_reduction <add>, %20, %cst [1] : vector<128x128xf32> to vector<128xf32>
      %22 = vector.shape_cast %21 : vector<128xf32> to vector<128x1xf32>
      %cst_10 = arith.constant 1.000000e-24 : f32
      %23 = vector.broadcast %cst_10 : f32 to vector<128x1xf32>
      %24 = arith.maximumf %22, %23 : vector<128x1xf32>
      %25 = math.rsqrt %24 : vector<128x1xf32>
      %26 = vector.broadcast %25 : vector<128x1xf32> to vector<128x128xf32>
      %27 = arith.mulf %19, %26 : vector<128x128xf32>
      %c0_11 = arith.constant 0 : index
      %c0_12 = arith.constant 0 : index
      %28 = vector.load %arg9[%c0_11, %c0_12] : memref<128x128xbf16, #tpu.memory_space<vmem>>, vector<128x128xbf16>
      %29 = arith.extf %28 : vector<128x128xbf16> to vector<128x128xf32>
      %30 = arith.mulf %29, %29 : vector<128x128xf32>
      %cst_13 = arith.constant dense<0.000000e+00> : vector<128xf32>
      %31 = vector.multi_reduction <add>, %30, %cst_13 [1] : vector<128x128xf32> to vector<128xf32>
      %32 = vector.shape_cast %31 : vector<128xf32> to vector<128x1xf32>
      %cst_14 = arith.constant 1.000000e-24 : f32
      %33 = vector.broadcast %cst_14 : f32 to vector<128x1xf32>
      %34 = arith.maximumf %32, %33 : vector<128x1xf32>
      %35 = math.rsqrt %34 : vector<128x1xf32>
      %36 = vector.broadcast %35 : vector<128x1xf32> to vector<128x128xf32>
      %37 = arith.mulf %29, %36 : vector<128x128xf32>
      %38 = arith.addf %27, %37 : vector<128x128xf32>
      %39 = arith.truncf %38 : vector<128x128xf32> to vector<128x128xbf16>
      %c0_15 = arith.constant 0 : index
      %c0_16 = arith.constant 0 : index
      %40 = vector.load %arg11[%c0_15, %c0_16] : memref<128x128xf32, #tpu.memory_space<vmem>>, vector<128x128xf32>
      %41 = arith.extui %17 : vector<128x128xi1> to vector<128x128xi32>
      %42 = arith.sitofp %41 : vector<128x128xi32> to vector<128x128xf32>
      %43 = arith.truncf %42 : vector<128x128xf32> to vector<128x128xbf16>
      %cst_17 = arith.constant dense<0.000000e+00> : vector<128x128xf32>
      %44 = tpu.matmul %43, %39, %cst_17 {dimension_numbers = #tpu.dot_dimension_numbers<[1], [0], [0], [1], [0, 0, 1, 1], [], []>} : vector<128x128xbf16>, vector<128x128xbf16>, vector<128x128xf32> -> vector<128x128xf32>
      %45 = arith.addf %40, %44 : vector<128x128xf32>
      %c0_18 = arith.constant 0 : index
      %c0_19 = arith.constant 0 : index
      %46 = vector.load %arg11[%c0_18, %c0_19] : memref<128x128xf32, #tpu.memory_space<vmem>>, vector<128x128xf32>
      tpu.vector_store %arg11[%c0_18, %c0_19], %45 {strides = array<i32>} : memref<128x128xf32, #tpu.memory_space<vmem>>, vector<128x128xf32>,
    } else {
    }
    %c1_i32 = arith.constant 1 : i32
    %10 = arith.cmpi eq, %arg0, %c1_i32 : i32
    %11 = arith.extui %10 : i1 to i32
    %c0_i32_4 = arith.constant 0 : i32
    %12 = arith.cmpi ne, %11, %c0_i32_4 : i32
    scf.if %12 {
      %c0_i32_5 = arith.constant 0 : i32
      %13 = arith.cmpi eq, %arg1, %c0_i32_5 : i32
      %14 = arith.extui %13 : i1 to i32
      %c0_i32_6 = arith.constant 0 : i32
      %15 = arith.cmpi ne, %14, %c0_i32_6 : i32
      scf.if %15 {
        %c0_37 = arith.constant 0 : index
        %c0_38 = arith.constant 0 : index
        %95 = vector.load %arg11[%c0_37, %c0_38] : memref<128x128xf32, #tpu.memory_space<vmem>>, vector<128x128xf32>
        %c0_39 = arith.constant 0 : index
        %c0_40 = arith.constant 0 : index
        %96 = vector.load %arg6[%c0_39, %c0_40] : memref<128x1xf32, #tpu.memory_space<vmem>>, vector<128x1xf32>
        %97 = vector.broadcast %96 : vector<128x1xf32> to vector<128x128xf32>
        %98 = arith.mulf %95, %97 : vector<128x128xf32>
        %99 = arith.truncf %98 : vector<128x128xf32> to vector<128x128xbf16>
        %c0_41 = arith.constant 0 : index
        %c0_42 = arith.constant 0 : index
        %100 = vector.load %arg12[%c0_41, %c0_42] : memref<128x128xbf16, #tpu.memory_space<vmem>>, vector<128x128xbf16>
        tpu.vector_store %arg12[%c0_41, %c0_42], %99 {strides = array<i32>} : memref<128x128xbf16, #tpu.memory_space<vmem>>, vector<128x128xbf16>,
      } else {
      }
      %c0 = arith.constant 0 : index
      %c0_7 = arith.constant 0 : index
      %16 = vector.load %arg12[%c0, %c0_7] : memref<128x128xbf16, #tpu.memory_space<vmem>>, vector<128x128xbf16>
      %c0_8 = arith.constant 0 : index
      %c0_9 = arith.constant 0 : index
      %17 = vector.load %arg7[%c0_8, %c0_9] : memref<1x128xf32, #tpu.memory_space<vmem>>, vector<1x128xf32>
      %c0_10 = arith.constant 0 : index
      %c0_11 = arith.constant 0 : index
      %18 = vector.load %arg5[%c0_10, %c0_11] : memref<128x1xi32, #tpu.memory_space<vmem>>, vector<128x1xi32>
      %c0_12 = arith.constant 0 : index
      %c0_13 = arith.constant 0 : index
      %19 = vector.load %arg3[%c0_12, %c0_13] : memref<1x128xi32, #tpu.memory_space<vmem>>, vector<1x128xi32>
      %20 = vector.broadcast %18 : vector<128x1xi32> to vector<128x128xi32>
      %21 = vector.broadcast %19 : vector<1x128xi32> to vector<128x128xi32>
      %22 = arith.cmpi eq, %20, %21 : vector<128x128xi32>
      %23 = arith.extui %22 : vector<128x128xi1> to vector<128x128xi32>
      %24 = arith.sitofp %23 : vector<128x128xi32> to vector<128x128xf32>
      %c0_14 = arith.constant 0 : index
      %c0_15 = arith.constant 0 : index
      %25 = vector.load %arg8[%c0_14, %c0_15] : memref<128x128xbf16, #tpu.memory_space<vmem>>, vector<128x128xbf16>
      %26 = arith.extf %25 : vector<128x128xbf16> to vector<128x128xf32>
      %27 = arith.mulf %26, %26 : vector<128x128xf32>
      %cst = arith.constant dense<0.000000e+00> : vector<128xf32>
      %28 = vector.multi_reduction <add>, %27, %cst [1] : vector<128x128xf32> to vector<128xf32>
      %29 = vector.shape_cast %28 : vector<128xf32> to vector<128x1xf32>
      %cst_16 = arith.constant 1.000000e-24 : f32
      %30 = vector.broadcast %cst_16 : f32 to vector<128x1xf32>
      %31 = arith.maximumf %29, %30 : vector<128x1xf32>
      %32 = math.rsqrt %31 : vector<128x1xf32>
      %33 = vector.broadcast %32 : vector<128x1xf32> to vector<128x128xf32>
      %34 = arith.mulf %26, %33 : vector<128x128xf32>
      %35 = arith.truncf %34 : vector<128x128xf32> to vector<128x128xbf16>
      %cst_17 = arith.constant dense<0.000000e+00> : vector<128x128xf32>
      %36 = tpu.matmul %35, %16, %cst_17 {dimension_numbers = #tpu.dot_dimension_numbers<[1], [1], [0], [0], [0, 0, 1, 0], [], []>} : vector<128x128xbf16>, vector<128x128xbf16>, vector<128x128xf32> -> vector<128x128xf32>
      %37 = arith.mulf %36, %24 : vector<128x128xf32>
      %cst_18 = arith.constant dense<0.000000e+00> : vector<128xf32>
      %38 = vector.multi_reduction <add>, %37, %cst_18 [1] : vector<128x128xf32> to vector<128xf32>
      %39 = vector.shape_cast %38 : vector<128xf32> to vector<128x1xf32>
      %40 = vector.broadcast %17 : vector<1x128xf32> to vector<128x128xf32>
      %41 = arith.addf %36, %40 : vector<128x128xf32>
      %cst_19 = arith.constant dense<0xFF800000> : vector<128xf32>
      %42 = vector.multi_reduction <maximumf>, %41, %cst_19 [1] : vector<128x128xf32> to vector<128xf32>
      %43 = vector.shape_cast %42 : vector<128xf32> to vector<128x1xf32>
      %44 = vector.broadcast %43 : vector<128x1xf32> to vector<128x128xf32>
      %45 = arith.subf %41, %44 : vector<128x128xf32>
      %46 = math.exp %45 : vector<128x128xf32>
      %cst_20 = arith.constant dense<0.000000e+00> : vector<128xf32>
      %47 = vector.multi_reduction <add>, %46, %cst_20 [1] : vector<128x128xf32> to vector<128xf32>
      %48 = vector.shape_cast %47 : vector<128xf32> to vector<128x1xf32>
      %49 = math.log %48 : vector<128x1xf32>
      %50 = arith.addf %43, %49 : vector<128x1xf32>
      %51 = arith.subf %50, %39 : vector<128x1xf32>
      %c0_21 = arith.constant 0 : index
      %c0_22 = arith.constant 0 : index
      %52 = vector.load %arg9[%c0_21, %c0_22] : memref<128x128xbf16, #tpu.memory_space<vmem>>, vector<128x128xbf16>
      %53 = arith.extf %52 : vector<128x128xbf16> to vector<128x128xf32>
      %54 = arith.mulf %53, %53 : vector<128x128xf32>
      %cst_23 = arith.constant dense<0.000000e+00> : vector<128xf32>
      %55 = vector.multi_reduction <add>, %54, %cst_23 [1] : vector<128x128xf32> to vector<128xf32>
      %56 = vector.shape_cast %55 : vector<128xf32> to vector<128x1xf32>
      %cst_24 = arith.constant 1.000000e-24 : f32
      %57 = vector.broadcast %cst_24 : f32 to vector<128x1xf32>
      %58 = arith.maximumf %56, %57 : vector<128x1xf32>
      %59 = math.rsqrt %58 : vector<128x1xf32>
      %60 = vector.broadcast %59 : vector<128x1xf32> to vector<128x128xf32>
      %61 = arith.mulf %53, %60 : vector<128x128xf32>
      %62 = arith.truncf %61 : vector<128x128xf32> to vector<128x128xbf16>
      %cst_25 = arith.constant dense<0.000000e+00> : vector<128x128xf32>
      %63 = tpu.matmul %62, %16, %cst_25 {dimension_numbers = #tpu.dot_dimension_numbers<[1], [1], [0], [0], [0, 0, 1, 0], [], []>} : vector<128x128xbf16>, vector<128x128xbf16>, vector<128x128xf32> -> vector<128x128xf32>
      %64 = arith.mulf %63, %24 : vector<128x128xf32>
      %cst_26 = arith.constant dense<0.000000e+00> : vector<128xf32>
      %65 = vector.multi_reduction <add>, %64, %cst_26 [1] : vector<128x128xf32> to vector<128xf32>
      %66 = vector.shape_cast %65 : vector<128xf32> to vector<128x1xf32>
      %67 = vector.broadcast %17 : vector<1x128xf32> to vector<128x128xf32>
      %68 = arith.addf %63, %67 : vector<128x128xf32>
      %cst_27 = arith.constant dense<0xFF800000> : vector<128xf32>
      %69 = vector.multi_reduction <maximumf>, %68, %cst_27 [1] : vector<128x128xf32> to vector<128xf32>
      %70 = vector.shape_cast %69 : vector<128xf32> to vector<128x1xf32>
      %71 = vector.broadcast %70 : vector<128x1xf32> to vector<128x128xf32>
      %72 = arith.subf %68, %71 : vector<128x128xf32>
      %73 = math.exp %72 : vector<128x128xf32>
      %cst_28 = arith.constant dense<0.000000e+00> : vector<128xf32>
      %74 = vector.multi_reduction <add>, %73, %cst_28 [1] : vector<128x128xf32> to vector<128xf32>
      %75 = vector.shape_cast %74 : vector<128xf32> to vector<128x1xf32>
      %76 = math.log %75 : vector<128x1xf32>
      %77 = arith.addf %70, %76 : vector<128x1xf32>
      %78 = arith.subf %77, %66 : vector<128x1xf32>
      %79 = arith.addf %51, %78 : vector<128x1xf32>
      %80 = tpu.iota {dimensions = array<i32: 0>} : vector<128x1xi32>
      %81 = vector.broadcast %1 : i32 to vector<128x1xi32>
      %82 = arith.addi %80, %81 : vector<128x1xi32>
      %c8_i32 = arith.constant 8 : i32
      %83 = vector.broadcast %c8_i32 : i32 to vector<128x1xi32>
      %84 = arith.cmpi slt, %82, %83 : vector<128x1xi32>
      %cst_29 = arith.constant 0.000000e+00 : f32
      %85 = vector.broadcast %cst_29 : f32 to vector<128x1xf32>
      %86 = arith.select %84, %79, %85 : vector<128x1xi1>, vector<128x1xf32>
      %c0_30 = arith.constant 0 : index
      %c0_31 = arith.constant 0 : index
      %87 = vector.load %arg13[%c0_30, %c0_31] : memref<1x1xf32, #tpu.memory_space<vmem>>, vector<1x1xf32>
      %cst_32 = arith.constant dense<0.000000e+00> : vector<1xf32>
      %88 = vector.multi_reduction <add>, %86, %cst_32 [0] : vector<128x1xf32> to vector<1xf32>
      %89 = vector.shape_cast %88 : vector<1xf32> to vector<1x1xf32>
      %90 = arith.addf %87, %89 : vector<1x1xf32>
      %c0_33 = arith.constant 0 : index
      %c0_34 = arith.constant 0 : index
      %91 = vector.load %arg13[%c0_33, %c0_34] : memref<1x1xf32, #tpu.memory_space<vmem>>, vector<1x1xf32>
      tpu.vector_store %arg13[%c0_33, %c0_34], %90 {strides = array<i32>} : memref<1x1xf32, #tpu.memory_space<vmem>>, vector<1x1xf32>,
      %c0_i32_35 = arith.constant 0 : i32
      %92 = arith.cmpi eq, %arg1, %c0_i32_35 : i32
      %93 = arith.extui %92 : i1 to i32
      %c0_i32_36 = arith.constant 0 : i32
      %94 = arith.cmpi ne, %93, %c0_i32_36 : i32
      scf.if %94 {
        %c0_37 = arith.constant 0 : index
        %c0_38 = arith.constant 0 : index
        %95 = vector.load %arg13[%c0_37, %c0_38] : memref<1x1xf32, #tpu.memory_space<vmem>>, vector<1x1xf32>
        %cst_39 = arith.constant 6.250000e-02 : f32
        %96 = vector.broadcast %cst_39 : f32 to vector<1x1xf32>
        %97 = arith.mulf %95, %96 : vector<1x1xf32>
        %c0_40 = arith.constant 0 : index
        %c0_41 = arith.constant 0 : index
        %98 = vector.load %arg10[%c0_40, %c0_41] : memref<1x1xf32, #tpu.memory_space<vmem>>, vector<1x1xf32>
        tpu.vector_store %arg10[%c0_40, %c0_41], %97 {strides = array<i32>} : memref<1x1xf32, #tpu.memory_space<vmem>>, vector<1x1xf32>,
      } else {
      }
    } else {
    }
    return
  }
  func.func @transform_0(%arg0: i32, %arg1: i32) -> (i32, i32) {
    %c0_i32 = arith.constant 0 : i32
    %c0_i32_0 = arith.constant 0 : i32
    %c0_i32_1 = arith.constant 0 : i32
    return %c0_i32, %c0_i32_0 : i32, i32
  }
  func.func @transform_1(%arg0: i32, %arg1: i32) -> (i32, i32) {
    %c0_i32 = arith.constant 0 : i32
    %c0_i32_0 = arith.constant 0 : i32
    %c0_i32_1 = arith.constant 0 : i32
    return %c0_i32, %c0_i32_0 : i32, i32
  }
  func.func @transform_2(%arg0: i32, %arg1: i32) -> (i32, i32) {
    %c0_i32 = arith.constant 0 : i32
    %c0_i32_0 = arith.constant 0 : i32
    return %c0_i32, %arg1 : i32, i32
  }
  func.func @transform_3(%arg0: i32, %arg1: i32) -> (i32, i32) {
    %c0_i32 = arith.constant 0 : i32
    %c0_i32_0 = arith.constant 0 : i32
    return %arg1, %c0_i32 : i32, i32
  }
  func.func @transform_4(%arg0: i32, %arg1: i32) -> (i32, i32) {
    %c0_i32 = arith.constant 0 : i32
    %c0_i32_0 = arith.constant 0 : i32
    %c0_i32_1 = arith.constant 0 : i32
    return %c0_i32, %c0_i32_0 : i32, i32
  }
  func.func @transform_5(%arg0: i32, %arg1: i32) -> (i32, i32) {
    %c0_i32 = arith.constant 0 : i32
    %c0_i32_0 = arith.constant 0 : i32
    %c0_i32_1 = arith.constant 0 : i32
    return %c0_i32, %c0_i32_0 : i32, i32
  }
  func.func @transform_6(%arg0: i32, %arg1: i32) -> (i32, i32) {
    %c0_i32 = arith.constant 0 : i32
    %c0_i32_0 = arith.constant 0 : i32
    return %arg1, %c0_i32 : i32, i32
  }
  func.func @transform_7(%arg0: i32, %arg1: i32) -> (i32, i32) {
    %c0_i32 = arith.constant 0 : i32
    %c0_i32_0 = arith.constant 0 : i32
    return %arg1, %c0_i32 : i32, i32
  }
  func.func @transform_8(%arg0: i32, %arg1: i32) -> (i32, i32) {
    %c0_i32 = arith.constant 0 : i32
    %c0_i32_0 = arith.constant 0 : i32
    %c0_i32_1 = arith.constant 0 : i32
    return %c0_i32, %c0_i32_0 : i32, i32
  }
}

</mosaic_0001>

<bundles_post_ra>
// kernel: protoclr_loss.1
= control target key start
LH: loop header
LB: loop body
LE: loop exit
PB: predicated region body
PF: predicated region fallthrough
CT: control target
= control target key end

     0   :  { %13 = vsyncpa [#allocation6], 0  ;;  %s3515_s27 = smov 0   ;;  %s3517_s28 = smov 0   ;;  %s5224_s0 = inlined_call_operand.vmem [shape: s32[128,1], index: 0, kind: input, shape index: {}]   ;;  %s5225_s1 = inlined_call_operand.vmem [shape: s32[1,128], index: 1, kind: input, shape index: {}]   ;;  %s5226_s2 = inlined_call_operand.vmem [shape: s32[1,128], index: 2, kind: input, shape index: {}]   ;;  %s5227_s3 = inlined_call_operand.vmem [shape: s32[128,1], index: 3, kind: input, shape index: {}]   ;;  %s5228_s4 = inlined_call_operand.vmem [shape: f32[128,1], index: 4, kind: input, shape index: {}]   ;;  %s5229_s5 = inlined_call_operand.vmem [shape: f32[1,128], index: 5, kind: input, shape index: {}]   ;;  %s5230_s6 = inlined_call_operand.vmem [shape: bf16[128,128], index: 6, kind: input, shape index: {}]   ;;  %s5231_s7 = inlined_call_operand.vmem [shape: bf16[128,128], index: 7, kind: input, shape index: {}]   ;;  %s5232_s8 = inlined_call_operand.hbm [shape: f32[1,1], index: 8, kind: output, shape index: {}]  }
   0x1   :  { %s3519_s29 = smov 0  }
   0x2 LB: > { %s2881_s30 = sadd.s32 4294967295, %s3462_s29   ;;  %s31_s9 = sadd.s32 1, %s3458_s28  ;;  %s3462_s29 = sphi %s3519_s29, %s19_s29   ;;  %s3458_s28 = sphi %s3517_s28, %s5341_s28   ;;  %s3454_s27 = sphi %s3515_s27, %s5340_s27  }
   0x3   : > { %p33_p0 = scmp.ge.s32.totalorder %s31_s9, 2  ;;  %p2887_p1 = scmp.ge.s32.totalorder %s3462_s29, 1 }
   0x4   : > { %p301_p2 = scmp.lt.s32.totalorder %s3462_s29, 3 }
   0x5   : > { %s5343_s9 = smov (%p33_p0, %s31_s9), 0 }
   0x6   : > { %p302_p3 = pnand %p2887_p1, %p301_p2 }
   0x7   : > { %p365_p4 = scmp.eq.s32.totalorder (!%p302_p3), %s3454_s27, 0 }
   0x8   : > { %305 = sbr.rel (%p302_p3) target bundleno = 1093 (0x445), region = 52 }
   0xd   : > { %370 = sbr.rel (!%p365_p4) target bundleno = 31 (0x1f), region = 56  ;;  %v3464_v0 = vmov (%p365_p4), 0.0   ;;  %vm387_vm0 = vcmask (%p365_p4), 0  }
   0xe   : > { %371 = vst [vmem:[#allocation2 + $0x30] sm:$0xff] (%p365_p4), %v3464_v0 }
   0xf   : > { %372 = vst [vmem:[#allocation2] sm:$0xff] (%p365_p4), %v3464_v0 }
  0x10   : > { %373 = vst [vmem:[#allocation2 + $0x58] sm:$0xff] (%p365_p4), %v3464_v0 }
  0x11   : > { %374 = vst [vmem:[#allocation2 + $0x18] sm:$0xff] (%p365_p4), %v3464_v0 }
  0x12   : > { %375 = vst [vmem:[#allocation2 + $0x50] sm:$0xff] %v3464_v0 }
  0x13   : > { %376 = vst [vmem:[#allocation2 + $0x68] sm:$0xff] %v3464_v0 }
  0x14   : > { %377 = vst [vmem:[#allocation2 + $0x8] sm:$0xff] %v3464_v0 }
  0x15   : > { %378 = vst [vmem:[#allocation2 + $0x48] sm:$0xff] %v3464_v0 }
  0x16   : > { %379 = vst [vmem:[#allocation2 + $0x40] sm:$0xff] %v3464_v0 }
  0x17   : > { %380 = vst [vmem:[#allocation2 + $0x20] sm:$0xff] %v3464_v0 }
  0x18   : > { %381 = vst [vmem:[#allocation2 + $0x10] sm:$0xff] %v3464_v0 }
  0x19   : > { %382 = vst [vmem:[#allocation2 + $0x38] sm:$0xff] %v3464_v0 }
  0x1a   : > { %383 = vst [vmem:[#allocation2 + $0x60] sm:$0xff] %v3464_v0 }
  0x1b   : > { %384 = vst [vmem:[#allocation2 + $0x70] sm:$0xff] %v3464_v0 }
  0x1c   : > { %385 = vst [vmem:[#allocation2 + $0x78] sm:$0xff] %v3464_v0 }
  0x1d   : > { %386 = vst [vmem:[#allocation2 + $0x28] sm:$0xff] %v3464_v0 }
  0x1e   : > { %388 = vst.msk [vmem:[#allocation4] sm:$0x1] %vm387_vm0, %v3464_v0 }
  0x1f PF: > { %p2889_p5 = scmp.ne.s32.totalorder %s3454_s27, 0 }
  0x21   : > { %391 = sbr.rel (%p2889_p5) target bundleno = 437 (0x1b5), region = 60 }
  0x26   : > { %v3165_v1 = vld [vmem:[%s5231_s7 + $0x38] sm:$0xff]   ;;  %v3157_v3 = vld [vmem:[%s5230_s6 + $0x30] sm:$0xff]   ;;  %v3156_v17 = vld [vmem:[%s5230_s6 + $0x28] sm:$0xff]   ;;  %v3465_v58 = vmov 0  }
  0x27   : > { %v3158_v2 = vld [vmem:[%s5230_s6 + $0x38] sm:$0xff]   ;;  %v3547_v4 = vunpack.c.l.bf16 %v3165_v1  ;;  %v3551_v6 = vunpack.c.l.bf16 %v3157_v3  ;;  %v3559_v10 = vunpack.c.h.bf16 %v3165_v1  ;;  %v3563_v12 = vunpack.c.h.bf16 %v3157_v3  ;;  %v3164_v16 = vld [vmem:[%s5231_s7 + $0x30] sm:$0xff]   ;;  %v3163_v24 = vld [vmem:[%s5231_s7 + $0x28] sm:$0xff]   ;;  %3264 = vset.pattern.permute.xlu0 %v3465_v58  ;;  %3263 = vset.pattern.permute.xlu2 %v3465_v58 }
  0x28   : > { %v3549_v5 = vunpack.c.l.bf16 %v3158_v2  ;;  %v3561_v11 = vunpack.c.h.bf16 %v3158_v2  ;;  %v3577_v18 = vunpack.c.h.bf16 %v3164_v16  ;;  %v3579_v19 = vunpack.c.l.bf16 %v3164_v16  ;;  %v3155_v31 = vld [vmem:[%s5230_s6 + $0x20] sm:$0xff]   ;;  %v3154_v39 = vld [vmem:[%s5230_s6 + $0x18] sm:$0xff]   ;;  %v3153_v47 = vld [vmem:[%s5230_s6 + $0x10] sm:$0xff]   ;;  %3265 = vset.pattern.permute.xlu1 %v3465_v58 }
  0x29   : > { %v792_v7 = vmul.f32 %v3547_v4, %v3547_v4  ;;  %v518_v9 = vmul.f32 %v3551_v6, %v3551_v6  ;;  %v793_v13 = vmul.f32 %v3559_v10, %v3559_v10  ;;  %v519_v15 = vmul.f32 %v3563_v12, %v3563_v12  ;;  %v3162_v32 = vld [vmem:[%s5231_s7 + $0x20] sm:$0xff]   ;;  %v3161_v46 = vld [vmem:[%s5231_s7 + $0x18] sm:$0xff]   ;;  %v3160_v54 = vld [vmem:[%s5231_s7 + $0x10] sm:$0xff]  }
  0x2a   : > { %v520_v8 = vmul.f32 %v3549_v5, %v3549_v5  ;;  %v521_v14 = vmul.f32 %v3561_v11, %v3561_v11  ;;  %v3581_v20 = vunpack.c.l.bf16 %v3156_v17  ;;  %v791_v21 = vmul.f32 %v3577_v18, %v3577_v18  ;;  %v3152_v62 = vld [vmem:[%s5230_s6 + $0x8] sm:$0xff]   ;;  %v398_v58 = vld [vmem:[%s5224_s0 + $0x30] sm:$0xff] }
  0x2b   : > { %822 = vadd.xlane.f32.xlu1 %v792_v7  ;;  %546 = vadd.xlane.f32.xlu2 %v518_v9  ;;  %v790_v22 = vmul.f32 %v3579_v19, %v3579_v19  ;;  %v3592_v25 = vunpack.c.l.bf16 %v3163_v24  ;;  %v3594_v26 = vunpack.c.h.bf16 %v3156_v17  ;;  %v3596_v27 = vunpack.c.h.bf16 %v3163_v24  ;;  %v3159_v63 = vld [vmem:[%s5231_s7 + $0x8] sm:$0xff]   ;;  %v2985_v9 = vld [vmem:[%s5230_s6] sm:$0xff]  }
  0x2c   : > { %550 = vadd.xlane.f32.xlu0 %v520_v8  ;;  %v516_v23 = vmul.f32 %v3581_v20, %v3581_v20  ;;  %v3610_v33 = vunpack.c.h.bf16 %v3155_v31  ;;  %v3612_v34 = vunpack.c.l.bf16 %v3155_v31  ;;  %v3614_v35 = vunpack.c.l.bf16 %v3162_v32  ;;  %v401_v31 = vld [vmem:[%s5224_s0 + $0x48] sm:$0xff] }
  0x2d   : > { %v788_v28 = vmul.f32 %v3592_v25, %v3592_v25  ;;  %v517_v29 = vmul.f32 %v3594_v26, %v3594_v26  ;;  %v789_v30 = vmul.f32 %v3596_v27, %v3596_v27  ;;  %v3625_v40 = vunpack.c.h.bf16 %v3162_v32  ;;  %v405_v32 = vld [vmem:[%s5224_s0 + $0x68] sm:$0xff] }
  0x2e   : > { %v515_v36 = vmul.f32 %v3610_v33, %v3610_v33  ;;  %v514_v37 = vmul.f32 %v3612_v34, %v3612_v34  ;;  %v786_v38 = vmul.f32 %v3614_v35, %v3614_v35  ;;  %v3627_v41 = vunpack.c.l.bf16 %v3154_v39 }
  0x2f   : > { %v3629_v42 = vunpack.c.h.bf16 %v3154_v39  ;;  %v787_v43 = vmul.f32 %v3625_v40, %v3625_v40  ;;  %v3643_v48 = vunpack.c.l.bf16 %v3161_v46  ;;  %v3645_v49 = vunpack.c.h.bf16 %v3161_v46  ;;  %v393_v39 = vld [vmem:[%s5224_s0 + $0x8] sm:$0xff] }
  0x30   : > { %v512_v44 = vmul.f32 %v3627_v41, %v3627_v41  ;;  %v3647_v50 = vunpack.c.l.bf16 %v3153_v47  ;;  %v3658_v55 = vunpack.c.l.bf16 %v3160_v54  ;;  %v3660_v56 = vunpack.c.h.bf16 %v3153_v47 }
  0x31   : > { %v513_v45 = vmul.f32 %v3629_v42, %v3629_v42  ;;  %v784_v51 = vmul.f32 %v3643_v48, %v3643_v48  ;;  %v785_v52 = vmul.f32 %v3645_v49, %v3645_v49  ;;  %v3662_v57 = vunpack.c.h.bf16 %v3160_v54  ;;  %v397_v54 = vld [vmem:[%s5224_s0 + $0x28] sm:$0xff] }
  0x32   : > { %v510_v53 = vmul.f32 %v3647_v50, %v3647_v50  ;;  %v782_v59 = vmul.f32 %v3658_v55, %v3658_v55  ;;  %v511_v60 = vmul.f32 %v3660_v56, %v3660_v56  ;;  %v3676_v0 = vunpack.c.h.bf16 %v3152_v62 }
  0x33   : > { %824 = vadd.xlane.f32.xlu1 %v793_v13  ;;  %548 = vadd.xlane.f32.xlu2 %v519_v15  ;;  %v783_v61 = vmul.f32 %v3662_v57, %v3662_v57  ;;  %v3678_v1 = vunpack.c.l.bf16 %v3152_v62  ;;  %v3680_v2 = vunpack.c.l.bf16 %v3159_v63  ;;  %v3691_v13 = vunpack.c.h.bf16 %v3159_v63 }
  0x34   : > { %552 = vadd.xlane.f32.xlu0 %v521_v14  ;;  %v509_v3 = vmul.f32 %v3676_v0, %v3676_v0  ;;  %v3693_v14 = vunpack.c.l.bf16 %v2985_v9  ;;  %v3695_v15 = vunpack.c.h.bf16 %v2985_v9 }
  0x35   : > { %v508_v7 = vmul.f32 %v3678_v1, %v3678_v1  ;;  %v780_v8 = vmul.f32 %v3680_v2, %v3680_v2  ;;  %v781_v16 = vmul.f32 %v3691_v13, %v3691_v13 }
  0x36   : > { %v506_v17 = vmul.f32 %v3693_v14, %v3693_v14 }
  0x3b   : > { %820 = vadd.xlane.f32.xlu1 %v791_v21  ;;  %542 = vadd.xlane.f32.xlu2 %v516_v23  ;;  %v507_v21 = vmul.f32 %v3695_v15, %v3695_v15 }
  0x3c   : > { %818 = vadd.xlane.f32.xlu0 %v790_v22  ;;  %v3017_v22 = vld [vmem:[%s5231_s7] sm:$0xff]  }
  0x3d   : > { %v3706_v23 = vunpack.c.l.bf16 %v3017_v22  ;;  %v3708_v24 = vunpack.c.h.bf16 %v3017_v22  ;;  %v406_v22 = vld [vmem:[%s5224_s0 + $0x70] sm:$0xff] }
  0x3f   : > { %5234 = vst [vmem:[#allocation8_spill] sm:$0xff] %v3708_v24 }
  0x43   : > { %814 = vadd.xlane.f32.xlu1 %v788_v28  ;;  %816 = vadd.xlane.f32.xlu2 %v789_v30  ;;  %v778_v28 = vmul.f32 %v3706_v23, %v3706_v23  ;;  %v400_v30 = vld [vmem:[%s5224_s0 + $0x40] sm:$0xff] }
  0x44   : > { %544 = vadd.xlane.f32.xlu0 %v517_v29  ;;  %v779_v29 = vmul.f32 %v3708_v24, %v3708_v24 }
  0x4b   : > { %540 = vadd.xlane.f32.xlu1 %v515_v36  ;;  %810 = vadd.xlane.f32.xlu2 %v786_v38  ;;  %v404_v36 = vld [vmem:[%s5224_s0 + $0x60] sm:$0xff] }
  0x4c   : > { %538 = vadd.xlane.f32.xlu0 %v514_v37  ;;  %v402_v37 = vld [vmem:[%s5224_s0 + $0x50] sm:$0xff]  ;;  %v392_v38 = vld [vmem:[%s5224_s0] sm:$0xff] }
  0x53   : > { %534 = vadd.xlane.f32.xlu1 %v512_v44  ;;  %536 = vadd.xlane.f32.xlu2 %v513_v45 }
  0x54   : > { %812 = vadd.xlane.f32.xlu0 %v787_v43  ;;  %v407_v43 = vld [vmem:[%s5224_s0 + $0x78] sm:$0xff] }
  0x5b   : > { %808 = vadd.xlane.f32.xlu1 %v785_v52  ;;  %530 = vadd.xlane.f32.xlu2 %v510_v53  ;;  %v396_v53 = vld [vmem:[%s5224_s0 + $0x20] sm:$0xff] }
  0x5c   : > { %806 = vadd.xlane.f32.xlu0 %v784_v51 }
  0x63   : > { %802 = vadd.xlane.f32.xlu1 %v782_v59  ;;  %804 = vadd.xlane.f32.xlu2 %v783_v61 }
  0x64   : > { %532 = vadd.xlane.f32.xlu0 %v511_v60 }
  0x6b   : > { %528 = vadd.xlane.f32.xlu1 %v509_v3  ;;  %798 = vadd.xlane.f32.xlu2 %v780_v8 }
  0x6c   : > { %526 = vadd.xlane.f32.xlu0 %v508_v7 }
  0x73   : > { %522 = vadd.xlane.f32.xlu1 %v506_v17  ;;  %524 = vadd.xlane.f32.xlu2 %v507_v21  ;;  %v403_v21 = vld [vmem:[%s5224_s0 + $0x58] sm:$0xff] }
  0x74   : > { %800 = vadd.xlane.f32.xlu0 %v781_v16 }
  0x7b   : > { %796 = vadd.xlane.f32.xlu1 %v779_v29 }
  0x7c   : > { %794 = vadd.xlane.f32.xlu0 %v778_v28 }
  0x8b   : > { %434 = vperm.xlu2 %3263, %v400_v30  }
  0x90   : > { %437 = vperm.xlu0 %3264, %v401_v31  }
  0x93   : > { %449 = vperm.xlu2 %3263, %v405_v32  }
  0x94   : > { %446 = vperm.xlu1 %3265, %v404_v36  }
  0x98   : > { %440 = vperm.xlu0 %3264, %v402_v37  }
  0x9b   : > { %410 = vperm.xlu2 %3263, %v392_v38  }
  0x9c   : > { %413 = vperm.xlu1 %3265, %v393_v39  }
  0x9e   : > { %v823_v44 = vpop.xlane.xlu1 %822  ;;  %v547_v51 = vpop.xlane.xlu2 %546 }
  0x9f   : > { %v551_v45 = vpop.xlane.xlu0 %550  ;;  %v3738_v46 = vmax.f32 %v823_v44, 1e-24  ;;  %v3742_v52 = vmax.f32 %v547_v51, 1e-24 }
  0xa0   : > { %v3740_v47 = vmax.f32 %v551_v45, 1e-24  ;;  %455 = vperm.xlu0 %3264, %v407_v43  }
  0xa1   : > { %3267 = vrsqrt.f32 %v3738_v46  ;;  %vm988_vm1 = vweird.f32 %v3738_v46  ;;  %vm696_vm3 = vweird.f32 %v3742_v52 }
  0xa2   : > { %3269 = vrsqrt.f32 %v3740_v47  ;;  %vm716_vm2 = vweird.f32 %v3740_v47 }
  0xa3   : > { %3271 = vrsqrt.f32 %v3742_v52  ;;  %422 = vperm.xlu2 %3263, %v396_v53  }
  0xa4   : > { %425 = vperm.xlu1 %3265, %v397_v54  }
  0xa6   : > { %v825_v59 = vpop.xlane.xlu1 %824  ;;  %v549_v3 = vpop.xlane.xlu2 %548 }
  0xa7   : > { %v553_v60 = vpop.xlane.xlu0 %552  ;;  %v3756_v61 = vpop.eup %3267  ;;  %v3758_v62 = vmax.f32 %v825_v59, 1e-24  ;;  %v3766_v9 = vmax.f32 %v549_v3, 1e-24  ;;  %v394_v3 = vld [vmem:[%s5224_s0 + $0x10] sm:$0xff] }
  0xa8   : > { %v3760_v63 = vmax.f32 %v553_v60, 1e-24  ;;  %428 = vperm.xlu0 %3264, %v398_v58   ;;  %v3762_v7 = vpop.eup %3269  ;;  %v983_v8 = vmul.f32 %v3756_v61, %v3738_v46  ;;  %vm989_vm4 = vweird.f32 %v3756_v61 }
  0xa9   : > { %v3768_v16 = vpop.eup %3271  ;;  %v711_v17 = vmul.f32 %v3762_v7, %v3740_v47  ;;  %3273 = vrsqrt.f32 %v3758_v62  ;;  %vm717_vm5 = vweird.f32 %v3762_v7  ;;  %vm3830_vm8 = vmor %vm988_vm1, %vm989_vm4  ;;  %vm998_vm13 = vweird.f32 %v3758_v62 }
  0xaa   : > { %v984_v28 = vmul.f32 %v3756_v61, %v983_v8  ;;  %v691_v29 = vmul.f32 %v3768_v16, %v3742_v52  ;;  %3275 = vrsqrt.f32 %v3760_v63  ;;  %v395_v8 = vld [vmem:[%s5224_s0 + $0x18] sm:$0xff]  ;;  %vm697_vm6 = vweird.f32 %v3768_v16  ;;  %vm3843_vm9 = vmor %vm716_vm2, %vm717_vm5 }
  0xab   : > { %v712_v30 = vmul.f32 %v3762_v7, %v711_v17  ;;  %3277 = vrsqrt.f32 %v3766_v9  ;;  %443 = vperm.xlu2 %3263, %v403_v21   ;;  %vm726_vm10 = vweird.f32 %v3760_v63  ;;  %vm3856_vm12 = vmor %vm696_vm3, %vm697_vm6  ;;  %vm706_vm0 = vweird.f32 %v3766_v9 }
  0xac   : > { %v692_v31 = vmul.f32 %v3768_v16, %v691_v29  ;;  %452 = vperm.xlu1 %3265, %v406_v22   ;;  %v985_v32 = vmul.f32 0.5, %v984_v28 }
  0xad   : > { %v713_v36 = vmul.f32 0.5, %v712_v30 }
  0xae   : > { %v821_v37 = vpop.xlane.xlu1 %820  ;;  %v693_v43 = vmul.f32 0.5, %v692_v31  ;;  %v543_v45 = vpop.xlane.xlu2 %542  ;;  %v986_v58 = vsub.f32 1.5, %v985_v32 }
  0xaf   : > { %v819_v38 = vpop.xlane.xlu0 %818  ;;  %v3786_v39 = vpop.eup %3273  ;;  %v3788_v44 = vmax.f32 %v821_v37, 1e-24  ;;  %v714_v17 = vsub.f32 1.5, %v713_v36 }
  0xb0   : > { %v3790_v51 = vpop.eup %3275  ;;  %v993_v53 = vmul.f32 %v3786_v39, %v3758_v62  ;;  %v3799_v60 = vmax.f32 %v819_v38, 1e-24  ;;  %v694_v28 = vsub.f32 1.5, %v693_v43  ;;  %v987_v31 = vmul.f32 %v3756_v61, %v986_v58 }
  0xb1   : > { %v3794_v54 = vpop.eup %3277  ;;  %v721_v59 = vmul.f32 %v3790_v51, %v3760_v63  ;;  %3279 = vrsqrt.f32 %v3788_v44  ;;  %vm999_vm7 = vweird.f32 %v3786_v39  ;;  %v715_v36 = vmul.f32 %v3762_v7, %v714_v17 }
  0xb2   : > { %v994_v21 = vmul.f32 %v3786_v39, %v993_v53  ;;  %v701_v22 = vmul.f32 %v3794_v54, %v3766_v9  ;;  %3281 = vrsqrt.f32 %v3799_v60  ;;  %v3822_v43 = vmax.f32 %v543_v45, 1e-24  ;;  %vm3871_vm14 = vmor %vm998_vm13, %vm999_vm7 }
  0xb3   : > { %v722_v29 = vmul.f32 %v3790_v51, %v721_v59  ;;  %416 = vperm.xlu2 %3263, %v394_v3   ;;  %v695_v3 = vmul.f32 %v3768_v16, %v694_v28  ;;  %vm727_vm11 = vweird.f32 %v3790_v51  ;;  %vm707_vm1 = vweird.f32 %v3794_v54 }
  0xb4   : > { %v995_v30 = vmul.f32 0.5, %v994_v21  ;;  %419 = vperm.xlu1 %3265, %v395_v8   ;;  %v702_v38 = vmul.f32 %v3794_v54, %v701_v22  ;;  %3283 = vrsqrt.f32 %v3822_v43  ;;  %vm3889_vm15 = vmor %vm726_vm10, %vm727_vm11  ;;  %vm978_vm2 = vweird.f32 %v3788_v44 }
  0xb5   : > { %v723_v32 = vmul.f32 0.5, %v722_v29  ;;  %vm968_vm3 = vweird.f32 %v3799_v60  ;;  %vm3954_vm6 = vmor %vm706_vm0, %vm707_vm1  ;;  %vm676_vm7 = vweird.f32 %v3822_v43 }
  0xb6   : > { %v996_v37 = vsub.f32 1.5, %v995_v30  ;;  %v815_v53 = vpop.xlane.xlu1 %814  ;;  %v817_v45 = vpop.xlane.xlu2 %816  ;;  %v399_v30 = vld [vmem:[%s5224_s0 + $0x38] sm:$0xff] }
  0xb7   : > { %v545_v59 = vpop.xlane.xlu0 %544  ;;  %v3824_v24 = vpop.eup %3279  ;;  %v724_v8 = vsub.f32 1.5, %v723_v32  ;;  %v3835_v17 = vmax.f32 %v815_v53, 1e-24  ;;  %v991_v32 = vsel %vm3830_vm8, %v3756_v61, %v987_v31  ;;  %v699_v61 = vsel %vm3856_vm12, %v3768_v16, %v695_v3 }
  0xb8   : > { %v3837_v21 = vmax.f32 %v545_v59, 1e-24  ;;  %v997_v46 = vmul.f32 %v3786_v39, %v996_v37  ;;  %v973_v28 = vmul.f32 %v3824_v24, %v3788_v44  ;;  %v703_v37 = vmul.f32 0.5, %v702_v38  ;;  %v3877_v53 = vpop.eup %3281 }
  0xb9   : > { %v725_v47 = vmul.f32 %v3790_v51, %v724_v8  ;;  %3285 = vrsqrt.f32 %v3835_v17  ;;  %v719_v59 = vsel %vm3843_vm9, %v3762_v7, %v715_v36  ;;  %v963_v16 = vmul.f32 %v3877_v53, %v3799_v60 }
  0xba   : > { %v974_v62 = vmul.f32 %v3824_v24, %v973_v28  ;;  %3287 = vrsqrt.f32 %v3837_v21  ;;  %v1001_v38 = vsel %vm3871_vm14, %v3786_v39, %v997_v46  ;;  %v1016_v63 = vmul.f32 %v3547_v4, %v991_v32  ;;  %v3912_v28 = vpop.eup %3283 }
  0xbb   : > { %v729_v7 = vsel %vm3889_vm15, %v3790_v51, %v725_v47  ;;  %431 = vperm.xlu2 %3263, %v399_v30   ;;  %v3905_v58 = vmax.f32 %v817_v45, 1e-24  ;;  %v744_v3 = vmul.f32 %v3549_v5, %v719_v59  ;;  %v3909_v39 = vmul.f32 %v3551_v6, %v699_v61 }
  0xbc   : > { %v975_v36 = vmul.f32 0.5, %v974_v62  ;;  %v704_v8 = vsub.f32 1.5, %v703_v37  ;;  %v964_v51 = vmul.f32 %v3877_v53, %v963_v16  ;;  %v1017_v4 = vmul.f32 %v3559_v10, %v1001_v38 }
  0xbd   : > { %v745_v29 = vmul.f32 %v3561_v11, %v729_v7  ;;  %3289 = vrsqrt.f32 %v3905_v58  ;;  %v671_v32 = vmul.f32 %v3912_v28, %v3822_v43  ;;  %vm979_vm4 = vweird.f32 %v3824_v24 }
  0xbe   : > { %v541_v22 = vpop.xlane.xlu1 %540  ;;  %v811_v45 = vpop.xlane.xlu2 %810  ;;  %v976_v6 = vsub.f32 1.5, %v975_v36  ;;  %v965_v30 = vmul.f32 0.5, %v964_v51  ;;  %v3938_v31 = vmul.f32 %v3794_v54, %v704_v8  ;;  %vm969_vm5 = vweird.f32 %v3877_v53  ;;  %vm3971_vm8 = vmor %vm978_vm2, %vm979_vm4 }
  0xbf   : > { %v539_v46 = vpop.xlane.xlu0 %538  ;;  %v3917_v47 = vmax.f32 %v541_v22, 1e-24  ;;  %v3919_v5 = vpop.eup %3285  ;;  %v3928_v11 = vmax.f32 %v811_v45, 1e-24  ;;  %v672_v59 = vmul.f32 %v3912_v28, %v671_v32  ;;  %v1033_v7 = vadd.f32 %v1017_v4, %v745_v29  ;;  %vm3981_vm11 = vmor %vm968_vm3, %vm969_vm5 }
  0xc0   : > { %v3924_v52 = vpop.eup %3287  ;;  %v943_v10 = vmul.f32 %v3919_v5, %v3835_v17  ;;  %v3931_v37 = vmax.f32 %v539_v46, 1e-24  ;;  %v966_v62 = vsub.f32 1.5, %v965_v30  ;;  %v1032_v16 = vadd.f32 %v1016_v63, %v744_v3 }
  0xc1   : > { %3291 = vrsqrt.f32 %v3917_v47  ;;  %v681_v61 = vmul.f32 %v3924_v52, %v3837_v21  ;;  %v977_v22 = vmul.f32 %v3824_v24, %v976_v6  ;;  %v673_v29 = vmul.f32 0.5, %v672_v59 }
  0xc2   : > { %v944_v38 = vmul.f32 %v3919_v5, %v943_v10  ;;  %3293 = vrsqrt.f32 %v3928_v11  ;;  %v967_v46 = vmul.f32 %v3877_v53, %v966_v62  ;;  %v709_v9 = vsel %vm3954_vm6, %v3794_v54, %v3938_v31 }
  0xc3   : > { %v682_v36 = vmul.f32 %v3924_v52, %v681_v61  ;;  %v3945_v51 = vpop.eup %3289  ;;  %3295 = vrsqrt.f32 %v3931_v37  ;;  %vm948_vm9 = vweird.f32 %v3835_v17  ;;  %vm686_vm10 = vweird.f32 %v3837_v21 }
  0xc4   : > { %v945_v8 = vmul.f32 0.5, %v944_v38  ;;  %v953_v3 = vmul.f32 %v3945_v51, %v3905_v58  ;;  %v1041_v10 = vpack.c.bf16 %v1033_v7, %v1032_v16  ;;  %vm958_vm12 = vweird.f32 %v3905_v58 }
  0xc5   : > { %v683_v63 = vmul.f32 0.5, %v682_v36  ;;  %v981_v38 = vsel %vm3971_vm8, %v3824_v24, %v977_v22  ;;  %v971_v60 = vsel %vm3981_vm11, %v3877_v53, %v967_v46  ;;  %vm677_vm13 = vweird.f32 %v3912_v28 }
  0xc6   : > { %v535_v6 = vpop.xlane.xlu1 %534  ;;  %v537_v62 = vpop.xlane.xlu2 %536  ;;  %v946_v59 = vsub.f32 1.5, %v945_v8  ;;  %v954_v44 = vmul.f32 %v3945_v51, %v953_v3  ;;  %1098 = vmatpush.bf16.msra.mxu0 %v1041_v10  ;;  %3187 = vmatpush.bf16.msra.mxu1 %v1041_v10  ;;  %v674_v36 = vsub.f32 1.5, %v673_v29  ;;  %vm949_vm14 = vweird.f32 %v3919_v5  ;;  %vm4057_vm6 = vmor %vm676_vm7, %vm677_vm13 }
  0xc7   : > { %v813_v45 = vpop.xlane.xlu0 %812  ;;  %v3961_v30 = vpop.eup %3291  ;;  %v684_v7 = vsub.f32 1.5, %v683_v63  ;;  %3188 = vmatpush.bf16.msra.mxu2 %v1041_v10  ;;  %3189 = vmatpush.bf16.msra.mxu3 %v1041_v10  ;;  %vm687_vm15 = vweird.f32 %v3924_v52  ;;  %v4007_v53 = vmax.f32 %v537_v62, 1e-24  ;;  %v1014_v22 = vmul.f32 %v3579_v19, %v971_v60  ;;  %vm4020_vm1 = vmor %vm948_vm9, %vm949_vm14 }
  0xc8   : > { %v661_v61 = vmul.f32 %v3961_v30, %v3917_v47  ;;  %v3989_v31 = vpop.eup %3293  ;;  %v955_v16 = vmul.f32 0.5, %v954_v44  ;;  %v4000_v4 = vmax.f32 %v813_v45, 1e-24  ;;  %v947_v46 = vmul.f32 %v3919_v5, %v946_v59  ;;  %vm4031_vm2 = vmor %vm686_vm10, %vm687_vm15 }
  0xc9   : > { %v923_v8 = vmul.f32 %v3989_v31, %v3928_v11  ;;  %v4002_v3 = vpop.eup %3295  ;;  %v1015_v45 = vmul.f32 %v3577_v18, %v981_v38  ;;  %v685_v32 = vmul.f32 %v3924_v52, %v684_v7  ;;  %vm959_vm0 = vweird.f32 %v3945_v51 }
  0xca   : > { %v662_v24 = vmul.f32 %v3961_v30, %v661_v61  ;;  %v956_v29 = vsub.f32 1.5, %v955_v16  ;;  %v651_v10 = vmul.f32 %v4002_v3, %v3931_v37  ;;  %v675_v54 = vmul.f32 %v3912_v28, %v674_v36  ;;  %vm4044_vm4 = vmor %vm958_vm12, %vm959_vm0 }
  0xcb   : > { %v924_v63 = vmul.f32 %v3989_v31, %v923_v8  ;;  %3297 = vrsqrt.f32 %v4000_v4  ;;  %v743_v61 = vmul.f32 %v3563_v12, %v709_v9  ;;  %vm928_vm3 = vweird.f32 %v3928_v11 }
  0xcc   : > { %v957_v62 = vmul.f32 %v3945_v51, %v956_v29  ;;  %v663_v59 = vmul.f32 0.5, %v662_v24  ;;  %3299 = vrsqrt.f32 %v4007_v53  ;;  %v951_v7 = vsel %vm4020_vm1, %v3919_v5, %v947_v46 }
  0xcd   : > { %v925_v17 = vmul.f32 0.5, %v924_v63  ;;  %vm666_vm5 = vweird.f32 %v3917_v47  ;;  %v652_v21 = vmul.f32 %v4002_v3, %v651_v10  ;;  %v4050_v9 = vmax.f32 %v535_v6, 1e-24 }
  0xce   : > { %v809_v44 = vpop.xlane.xlu1 %808  ;;  %v531_v60 = vpop.xlane.xlu2 %530  ;;  %v1030_v36 = vadd.f32 %v1014_v22, %v3909_v39  ;;  %v689_v58 = vsel %vm4031_vm2, %v3924_v52, %v685_v32  ;;  %v961_v16 = vsel %vm4044_vm4, %v3945_v51, %v957_v62  ;;  %vm667_vm8 = vweird.f32 %v3961_v30 }
  0xcf   : > { %v807_v18 = vpop.xlane.xlu0 %806  ;;  %v1031_v6 = vadd.f32 %v1015_v45, %v743_v61  ;;  %v679_v39 = vsel %vm4057_vm6, %v3912_v28, %v675_v54  ;;  %v664_v43 = vsub.f32 1.5, %v663_v59  ;;  %3301 = vrsqrt.f32 %v4050_v9  ;;  %vm4108_vm12 = vmor %vm666_vm5, %vm667_vm8 }
  0xd0   : > { %v4072_v8 = vmax.f32 %v807_v18, 1e-24  ;;  %v1012_v24 = vmul.f32 %v3592_v25, %v951_v7  ;;  %v926_v22 = vsub.f32 1.5, %v925_v17  ;;  %v4075_v46 = vmax.f32 %v809_v44, 1e-24 }
  0xd1   : > { %v1040_v52 = vpack.c.bf16 %v1031_v6, %v1030_v36  ;;  %v4077_v29 = vpop.eup %3297  ;;  %v741_v51 = vmul.f32 %v3594_v26, %v689_v58  ;;  %v1013_v63 = vmul.f32 %v3596_v27, %v961_v16  ;;  %v653_v45 = vmul.f32 0.5, %v652_v21 }
  0xd2   : > { %vm656_vm7 = vweird.f32 %v3931_v37  ;;  %3303 = vrsqrt.f32 %v4072_v8  ;;  %v4083_v28 = vpop.eup %3299  ;;  %v740_v32 = vmul.f32 %v3581_v20, %v679_v39  ;;  %vm929_vm9 = vweird.f32 %v3989_v31 }
  0xd3   : > { %vm657_vm10 = vweird.f32 %v4002_v3  ;;  %v933_v25 = vmul.f32 %v4077_v29, %v4000_v4  ;;  %1099 = vmatpush.bf16.msra.mxu0 %v1040_v52  ;;  %3190 = vmatpush.bf16.msra.mxu1 %v1040_v52  ;;  %v665_v26 = vmul.f32 %v3961_v30, %v664_v43  ;;  %vm938_vm11 = vweird.f32 %v4000_v4  ;;  %vm4122_vm14 = vmor %vm928_vm3, %vm929_vm9 }
  0xd4   : > { %v641_v27 = vmul.f32 %v4083_v28, %v4007_v53  ;;  %3191 = vmatpush.bf16.msra.mxu2 %v1040_v52  ;;  %3192 = vmatpush.bf16.msra.mxu3 %v1040_v52  ;;  %3305 = vrsqrt.f32 %v4075_v46  ;;  %v927_v54 = vmul.f32 %v3989_v31, %v926_v22  ;;  %v4097_v62 = vmax.f32 %v531_v60, 1e-24  ;;  %vm4163_vm2 = vmor %vm656_vm7, %vm657_vm10 }
  0xd5   : > { %v934_v19 = vmul.f32 %v4077_v29, %v933_v25  ;;  %v1028_v59 = vadd.f32 %v1012_v24, %v740_v32  ;;  %v4099_v44 = vpop.eup %3301  ;;  %v654_v61 = vsub.f32 1.5, %v653_v45  ;;  %v1029_v17 = vadd.f32 %v1013_v63, %v741_v51 }
  0xd6   : > { %v803_v20 = vpop.xlane.xlu1 %802  ;;  %v805_v18 = vpop.xlane.xlu2 %804  ;;  %v642_v38 = vmul.f32 %v4083_v28, %v641_v27  ;;  %vm646_vm13 = vweird.f32 %v4007_v53  ;;  %v631_v21 = vmul.f32 %v4099_v44, %v4050_v9  ;;  %3307 = vrsqrt.f32 %v4097_v62 }
  0xd7   : > { %v533_v10 = vpop.xlane.xlu0 %532  ;;  %v4102_v7 = vmax.f32 %v803_v20, 1e-24  ;;  %v935_v60 = vmul.f32 0.5, %v934_v19  ;;  %v669_v5 = vsel %vm4108_vm12, %v3961_v30, %v665_v26  ;;  %v1039_v16 = vpack.c.bf16 %v1029_v17, %v1028_v59 }
  0xd8   : > { %v4116_v36 = vpop.eup %3303  ;;  %v643_v58 = vmul.f32 0.5, %v642_v38  ;;  %v931_v6 = vsel %vm4122_vm14, %v3989_v31, %v927_v54  ;;  %v632_v43 = vmul.f32 %v4099_v44, %v631_v21  ;;  %v655_v22 = vmul.f32 %v4002_v3, %v654_v61 }
  0xd9   : > { %3309 = vrsqrt.f32 %v4102_v7  ;;  %v936_v39 = vsub.f32 1.5, %v935_v60  ;;  %v903_v11 = vmul.f32 %v4116_v36, %v4072_v8  ;;  %vm939_vm15 = vweird.f32 %v4077_v29  ;;  %1100 = vmatpush.bf16.msra.mxu0 %v1039_v16  ;;  %3193 = vmatpush.bf16.msra.mxu1 %v1039_v16 }
  0xda   : > { %v4136_v24 = vpop.eup %3305  ;;  %v644_v30 = vsub.f32 1.5, %v643_v58  ;;  %vm636_vm0 = vweird.f32 %v4050_v9  ;;  %v4141_v52 = vmax.f32 %v533_v10, 1e-24  ;;  %v633_v51 = vmul.f32 0.5, %v632_v43  ;;  %3194 = vmatpush.bf16.msra.mxu2 %v1039_v16  ;;  %3195 = vmatpush.bf16.msra.mxu3 %v1039_v16  ;;  %vm4177_vm3 = vmor %vm938_vm11, %vm939_vm15 }
  0xdb   : > { %v937_v31 = vmul.f32 %v4077_v29, %v936_v39  ;;  %v904_v63 = vmul.f32 %v4116_v36, %v903_v11  ;;  %v913_v45 = vmul.f32 %v4136_v24, %v4075_v46  ;;  %v4148_v32 = vmul.f32 %v3610_v33, %v669_v5 }
  0xdc   : > { %vm908_vm1 = vweird.f32 %v4072_v8  ;;  %3311 = vrsqrt.f32 %v4141_v52  ;;  %v4152_v25 = vmax.f32 %v805_v18, 1e-24  ;;  %v4154_v27 = vpop.eup %3307  ;;  %v4157_v20 = vmul.f32 %v3614_v35, %v931_v6 }
  0xdd   : > { %v634_v33 = vsub.f32 1.5, %v633_v51  ;;  %v905_v54 = vmul.f32 0.5, %v904_v63  ;;  %v914_v19 = vmul.f32 %v4136_v24, %v913_v45  ;;  %v659_v35 = vsel %vm4163_vm2, %v4002_v3, %v655_v22 }
  0xde   : > { %v529_v26 = vpop.xlane.xlu1 %528  ;;  %v799_v59 = vpop.xlane.xlu2 %798  ;;  %vm647_vm4 = vweird.f32 %v4083_v28  ;;  %vm637_vm5 = vweird.f32 %v4099_v44  ;;  %v611_v38 = vmul.f32 %v4154_v27, %v4097_v62  ;;  %v941_v17 = vsel %vm4177_vm3, %v4077_v29, %v937_v31 }
  0xdf   : > { %v527_v18 = vpop.xlane.xlu0 %526  ;;  %v4168_v61 = vpop.eup %3309  ;;  %v645_v3 = vmul.f32 %v4083_v28, %v644_v30  ;;  %v635_v12 = vmul.f32 %v4099_v44, %v634_v33  ;;  %v915_v4 = vmul.f32 0.5, %v914_v19  ;;  %v906_v60 = vsub.f32 1.5, %v905_v54  ;;  %vm4203_vm7 = vmor %vm646_vm13, %vm647_vm4 }
  0xe0   : > { %v612_v21 = vmul.f32 %v4154_v27, %v611_v38  ;;  %v883_v47 = vmul.f32 %v4168_v61, %v4102_v7  ;;  %3313 = vrsqrt.f32 %v4152_v25  ;;  %v738_v5 = vmul.f32 %v3612_v34, %v659_v35  ;;  %vm4219_vm10 = vmor %vm636_vm0, %vm637_vm5 }
  0xe1   : > { %v916_v58 = vsub.f32 1.5, %v915_v4  ;;  %vm918_vm6 = vweird.f32 %v4075_v46  ;;  %vm616_vm8 = vweird.f32 %v4097_v62  ;;  %vm909_vm9 = vweird.f32 %v4116_v36 }
  0xe2   : > { %v4197_v29 = vpop.eup %3311  ;;  %v613_v6 = vmul.f32 0.5, %v612_v21  ;;  %v884_v34 = vmul.f32 %v4168_v61, %v883_v47  ;;  %v4209_v39 = vmax.f32 %v799_v59, 1e-24  ;;  %v1011_v43 = vmul.f32 %v3625_v40, %v941_v17  ;;  %vm4249_vm15 = vmor %vm908_vm1, %vm909_vm9 }
  0xe3   : > { %v649_v11 = vsel %vm4203_vm7, %v4083_v28, %v645_v3  ;;  %vm919_vm11 = vweird.f32 %v4136_v24  ;;  %v621_v22 = vmul.f32 %v4197_v29, %v4141_v52  ;;  %v639_v40 = vsel %vm4219_vm10, %v4099_v44, %v635_v12 }
  0xe4   : > { %v907_v30 = vmul.f32 %v4116_v36, %v906_v60  ;;  %v885_v28 = vmul.f32 0.5, %v884_v34  ;;  %vm888_vm12 = vweird.f32 %v4102_v7  ;;  %3315 = vrsqrt.f32 %v4209_v39  ;;  %vm4265_vm1 = vmor %vm918_vm6, %vm919_vm11 }
  0xe5   : > { %v917_v9 = vmul.f32 %v4136_v24, %v916_v58  ;;  %v614_v31 = vsub.f32 1.5, %v613_v6  ;;  %v622_v51 = vmul.f32 %v4197_v29, %v621_v22  ;;  %v4234_v63 = vmax.f32 %v529_v26, 1e-24 }
  0xe6   : > { %v525_v45 = vpop.xlane.xlu2 %524  ;;  %v4236_v10 = vpop.eup %3313  ;;  %v4239_v33 = vmul.f32 %v3629_v42, %v649_v11  ;;  %vm617_vm13 = vweird.f32 %v4154_v27  ;;  %v886_v44 = vsub.f32 1.5, %v885_v28  ;;  %vm626_vm14 = vweird.f32 %v4141_v52 }
  0xe7   : > { %v4243_v54 = vmax.f32 %v527_v18, 1e-24  ;;  %vm889_vm0 = vweird.f32 %v4168_v61  ;;  %v623_v19 = vmul.f32 0.5, %v622_v51  ;;  %v893_v42 = vmul.f32 %v4236_v10, %v4152_v25  ;;  %v801_v59 = vpop.xlane.xlu0 %800  ;;  %v523_v35 = vpop.xlane.xlu1 %522  ;;  %vm4292_vm4 = vmor %vm616_vm8, %vm617_vm13 }
  0xe8   : > { %3317 = vrsqrt.f32 %v4234_v63  ;;  %v736_v18 = vmul.f32 %v3627_v41, %v639_v40  ;;  %v911_v8 = vsel %vm4249_vm15, %v4116_v36, %v907_v30  ;;  %vm898_vm2 = vweird.f32 %v4152_v25  ;;  %vm4307_vm6 = vmor %vm888_vm12, %vm889_vm0 }
  0xe9   : > { %3319 = vrsqrt.f32 %v4243_v54  ;;  %v921_v41 = vsel %vm4265_vm1, %v4136_v24, %v917_v9  ;;  %v615_v38 = vmul.f32 %v4154_v27, %v614_v31  ;;  %vm627_vm3 = vweird.f32 %v4197_v29 }
  0xea   : > { %v894_v36 = vmul.f32 %v4236_v10, %v893_v42  ;;  %v4277_v17 = vpop.eup %3315  ;;  %v887_v46 = vmul.f32 %v4168_v61, %v886_v44  ;;  %v1026_v3 = vadd.f32 %v4157_v20, %v738_v5  ;;  %v1027_v12 = vadd.f32 %v1011_v43, %v4148_v32  ;;  %vm4339_vm9 = vmor %vm626_vm14, %vm627_vm3 }
  0xeb   : > { %v4282_v4 = vmax.f32 %v801_v59, 1e-24  ;;  %v1008_v60 = vmul.f32 %v3643_v48, %v911_v8  ;;  %v624_v21 = vsub.f32 1.5, %v623_v19  ;;  %v863_v47 = vmul.f32 %v4277_v17, %v4209_v39 }
  0xec   : > { %v895_v24 = vmul.f32 0.5, %v894_v36  ;;  %v1009_v58 = vmul.f32 %v3645_v49, %v921_v41  ;;  %vm868_vm5 = vweird.f32 %v4209_v39  ;;  %v1038_v32 = vpack.c.bf16 %v1027_v12, %v1026_v3 }
  0xed   : > { %3321 = vrsqrt.f32 %v4282_v4  ;;  %v619_v20 = vsel %vm4292_vm4, %v4154_v27, %v615_v38  ;;  %v864_v5 = vmul.f32 %v4277_v17, %v863_v47  ;;  %v4312_v6 = vmax.f32 %v525_v45, 1e-24 }
  0xee   : > { %v4298_v48 = vpop.eup %3317  ;;  %v896_v62 = vsub.f32 1.5, %v895_v24  ;;  %v4314_v34 = vpop.permute.xlu2 %434  ;;  %v891_v27 = vsel %vm4307_vm6, %v4168_v61, %v887_v46  ;;  %vm899_vm8 = vweird.f32 %v4236_v10  ;;  %1101 = vmatpush.bf16.msra.mxu0 %v1038_v32  ;;  %3196 = vmatpush.bf16.msra.mxu1 %v1038_v32  ;;  %v4324_v11 = vmax.f32 %v523_v35, 1e-24 }
  0xef   : > { %v4316_v43 = vpop.eup %3319  ;;  %v601_v7 = vmul.f32 %v4298_v48, %v4234_v63  ;;  %v625_v53 = vmul.f32 %v4197_v29, %v624_v21  ;;  %v865_v40 = vmul.f32 0.5, %v864_v5  ;;  %3197 = vmatpush.bf16.msra.mxu2 %v1038_v32  ;;  %3198 = vmatpush.bf16.msra.mxu3 %v1038_v32  ;;  %v734_v61 = vmul.f32 %v3647_v50, %v619_v20  ;;  %v795_v45 = vpop.xlane.xlu0 %794  ;;  %vm4350_vm11 = vmor %vm898_vm2, %vm899_vm8 }
  0xf0   : > { %v897_v22 = vmul.f32 %v4236_v10, %v896_v62  ;;  %v591_v30 = vmul.f32 %v4316_v43, %v4243_v54  ;;  %vm596_vm7 = vweird.f32 %v4243_v54  ;;  %3323 = vrsqrt.f32 %v4312_v6  ;;  %v797_v44 = vpop.xlane.xlu1 %796 }
  0xf1   : > { %v602_v28 = vmul.f32 %v4298_v48, %v601_v7  ;;  %v1006_v9 = vmul.f32 %v3658_v55, %v891_v27  ;;  %v866_v51 = vsub.f32 1.5, %v865_v40  ;;  %vm606_vm10 = vweird.f32 %v4234_v63 }
  0xf2   : > { %v592_v50 = vmul.f32 %v4316_v43, %v591_v30  ;;  %3325 = vrsqrt.f32 %v4324_v11  ;;  %vm869_vm12 = vweird.f32 %v4277_v17  ;;  %v1024_v19 = vadd.f32 %v1008_v60, %v736_v18 }
  0xf3   : > { %v3322_v26 = vpop.eup %3321  ;;  %v603_v52 = vmul.f32 0.5, %v602_v28  ;;  %v1025_v42 = vadd.f32 %v1009_v58, %v4239_v33  ;;  %v629_v59 = vsel %vm4339_vm9, %v4197_v29, %v625_v53  ;;  %v901_v35 = vsel %vm4350_vm11, %v4236_v10, %v897_v22  ;;  %vm4383_vm15 = vmor %vm868_vm5, %vm869_vm12 }
  0xf4   : > { %v593_v8 = vmul.f32 0.5, %v592_v50  ;;  %v873_v25 = vmul.f32 %v3322_v26, %v4282_v4  ;;  %v4363_v38 = vmax.f32 %v795_v45, 1e-24  ;;  %v4365_v36 = vmax.f32 %v797_v44, 1e-24 }
  0xf5   : > { %v604_v37 = vsub.f32 1.5, %v603_v52  ;;  %v1037_v41 = vpack.c.bf16 %v1025_v42, %v1024_v19  ;;  %v867_v18 = vmul.f32 %v4277_v17, %v866_v51  ;;  %vm597_vm13 = vweird.f32 %v4316_v43 }
  0xf6   : > { %v594_v33 = vsub.f32 1.5, %v593_v8  ;;  %v874_v46 = vmul.f32 %v3322_v26, %v873_v25  ;;  %v4369_v29 = vpop.permute.xlu2 %449  ;;  %v4371_v3 = vpop.eup %3323  ;;  %v735_v10 = vmul.f32 %v3660_v56, %v629_v59  ;;  %v1007_v12 = vmul.f32 %v3662_v57, %v901_v35  ;;  %vm4395_vm0 = vmor %vm596_vm7, %vm597_vm13 }
  0xf7   : > { %vm607_vm14 = vweird.f32 %v4298_v48  ;;  %1102 = vmatpush.bf16.msra.mxu0 %v1037_v41  ;;  %3199 = vmatpush.bf16.msra.mxu1 %v1037_v41  ;;  %3327 = vrsqrt.f32 %v4363_v38  ;;  %v605_v56 = vmul.f32 %v4298_v48, %v604_v37  ;;  %v581_v47 = vmul.f32 %v4371_v3, %v4312_v6 }
  0xf8   : > { %v4377_v60 = vpop.eup %3325  ;;  %v595_v57 = vmul.f32 %v4316_v43, %v594_v33  ;;  %v875_v24 = vmul.f32 0.5, %v874_v46  ;;  %3200 = vmatpush.bf16.msra.mxu2 %v1037_v41  ;;  %3201 = vmatpush.bf16.msra.mxu3 %v1037_v41  ;;  %vm878_vm1 = vweird.f32 %v4282_v4  ;;  %vm879_vm2 = vweird.f32 %v3322_v26  ;;  %vm4414_vm3 = vmor %vm606_vm10, %vm607_vm14 }
  0xf9   : > { %v571_v58 = vmul.f32 %v4377_v60, %v4324_v11  ;;  %3329 = vrsqrt.f32 %v4365_v36  ;;  %v871_v16 = vsel %vm4383_vm15, %v4277_v17, %v867_v18  ;;  %v582_v20 = vmul.f32 %v4371_v3, %v581_v47  ;;  %vm880_vm4 = vmor %vm878_vm1, %vm879_vm2 }
  0xfa   : > { %v599_v54 = vsel %vm4395_vm0, %v4316_v43, %v595_v57  ;;  %v876_v32 = vsub.f32 1.5, %v875_v24  ;;  %v1022_v5 = vadd.f32 %v1006_v9, %v734_v61  ;;  %v609_v17 = vsel %vm4414_vm3, %v4298_v48, %v605_v56  ;;  %v5293_v56 = vld [vmem:[#allocation8_spill] sm:$0xff]  ;;  %v3266_v24 = vld [vmem:[%s5226_s2] ss:$0 sm:$0xff] }
  0xfb   : > { %v572_v62 = vmul.f32 %v4377_v60, %v571_v58  ;;  %v583_v43 = vmul.f32 0.5, %v582_v20  ;;  %v1023_v7 = vadd.f32 %v1007_v12, %v735_v10  ;;  %v1004_v22 = vmul.f32 %v3680_v2, %v871_v16  ;;  %v1042_v20 = vld [vmem:[#allocation2 + $0x30] sm:$0xff] }
  0xfc   : > { %v877_v27 = vmul.f32 %v3322_v26, %v876_v32  ;;  %v732_v40 = vmul.f32 %v3678_v1, %v599_v54  ;;  %v733_v48 = vmul.f32 %v3676_v0, %v609_v17  ;;  %vm586_vm5 = vweird.f32 %v4312_v6 }
  0xfd   : > { %v3328_v53 = vpop.eup %3327  ;;  %v573_v63 = vmul.f32 0.5, %v572_v62  ;;  %v1036_v50 = vpack.c.bf16 %v1023_v7, %v1022_v5  ;;  %v584_v2 = vsub.f32 1.5, %v583_v43  ;;  %vm577_vm6 = vweird.f32 %v4377_v60  ;;  %v1046_v5 = vld [vmem:[#allocation2 + $0x50] sm:$0xff]  ;;  %v1054_v43 = vld [vmem:[#allocation2 + $0x60] sm:$0xff] }
  0xfe   : > { %v881_v30 = vsel %vm880_vm4, %v3322_v26, %v877_v27  ;;  %v843_v61 = vmul.f32 %v3328_v53, %v4363_v38  ;;  %v4428_v28 = vpop.permute.xlu2 %410  ;;  %v1020_v4 = vadd.f32 %v1004_v22, %v732_v40  ;;  %vm587_vm8 = vweird.f32 %v4371_v3  ;;  %v1050_v27 = vld [vmem:[#allocation2 + $0x40] sm:$0xff] }
  0xff   : > { %v3330_v9 = vpop.eup %3329  ;;  %v1005_v31 = vmul.f32 %v3691_v13, %v881_v30  ;;  %v574_v51 = vsub.f32 1.5, %v573_v63  ;;  %1103 = vmatpush.bf16.msra.mxu0 %v1036_v50  ;;  %3202 = vmatpush.bf16.msra.mxu1 %v1036_v50  ;;  %vm576_vm7 = vweird.f32 %v4324_v11  ;;  %vm848_vm9 = vweird.f32 %v4363_v38  ;;  %vm4446_vm12 = vmor %vm586_vm5, %vm587_vm8 }
 0x100   : > { %v844_v45 = vmul.f32 %v3328_v53, %v843_v61  ;;  %v853_v1 = vmul.f32 %v3330_v9, %v4365_v36  ;;  %3203 = vmatpush.bf16.msra.mxu2 %v1036_v50  ;;  %3204 = vmatpush.bf16.msra.mxu3 %v1036_v50  ;;  %v585_v52 = vmul.f32 %v4371_v3, %v584_v2  ;;  %vm849_vm10 = vweird.f32 %v3328_v53  ;;  %vm4440_vm11 = vmor %vm576_vm7, %vm577_vm6 }
 0x101   : > { %v1021_v44 = vadd.f32 %v1005_v31, %v733_v48  ;;  %v575_v26 = vmul.f32 %v4377_v60, %v574_v51  ;;  %vm859_vm13 = vweird.f32 %v3330_v9  ;;  %vm850_vm14 = vmor %vm848_vm9, %vm849_vm10  ;;  %vm858_vm15 = vweird.f32 %v4365_v36  ;;  %v1051_v31 = vld [vmem:[#allocation2 + $0x20] sm:$0xff]  ;;  %v1055_v51 = vld [vmem:[#allocation2 + $0x70] sm:$0xff] }
 0x102   : > { %v845_v55 = vmul.f32 0.5, %v844_v45  ;;  %v854_v0 = vmul.f32 %v3330_v9, %v853_v1  ;;  %v438_v59 = vpop.permute.xlu0 %437  ;;  %v589_v6 = vsel %vm4446_vm12, %v4371_v3, %v585_v52  ;;  %vm860_vm0 = vmor %vm858_vm15, %vm859_vm13  ;;  %vm458_vm2 = vcmp.eq.s32.totalorder %v4428_v28, %v3266_v24  ;;  %v1056_v52 = vld [vmem:[#allocation2 + $0x78] sm:$0xff] }
 0x103   : > { %v1035_v13 = vpack.c.bf16 %v1021_v44, %v1020_v4  ;;  %v579_v25 = vsel %vm4440_vm11, %v4377_v60, %v575_v26  ;;  %v731_v21 = vmul.f32 %v3695_v15, %v589_v6  ;;  %vm467_vm3 = vcmp.eq.s32.totalorder %v438_v59, %v3266_v24  ;;  %v1044_v44 = vld [vmem:[#allocation2 + $0x58] sm:$0xff]  ;;  %v1048_v26 = vld [vmem:[#allocation2 + $0x8] sm:$0xff] }
 0x104   : > { %v846_v19 = vsub.f32 1.5, %v845_v55  ;;  %v855_v42 = vmul.f32 0.5, %v854_v0  ;;  %v730_v10 = vmul.f32 %v3693_v14, %v579_v25  ;;  %vm466_vm6 = vcmp.eq.s32.totalorder %v4314_v34, %v3266_v24  ;;  %v1045_v25 = vld [vmem:[#allocation2 + $0x18] sm:$0xff] }
 0x105   : > { %1104 = vmatpush.bf16.msra.mxu0 %v1035_v13  ;;  %3205 = vmatpush.bf16.msra.mxu1 %v1035_v13  ;;  %vm471_vm8 = vcmp.eq.s32.totalorder %v4369_v29, %v3266_v24  ;;  %vm2914_vm7 = vmpackc.low %vm467_vm3, %vm466_vm6  ;;  %v3466_v14 = vmov 1.0|1.0   ;;  %v1053_v6 = vld [vmem:[#allocation2 + $0x38] sm:$0xff] }
 0x106   : > { %v447_v8 = vpop.permute.xlu1 %446  ;;  %v847_v37 = vmul.f32 %v3328_v53, %v846_v19  ;;  %v856_v41 = vsub.f32 1.5, %v855_v42  ;;  %3206 = vmatpush.bf16.msra.mxu2 %v1035_v13  ;;  %3207 = vmatpush.bf16.msra.mxu3 %v1035_v13  ;;  %v423_v18 = vpop.permute.xlu2 %422  ;;  %v1052_v13 = vld [vmem:[#allocation2 + $0x10] sm:$0xff] }
 0x107   : > { %vm470_vm4 = vcmp.eq.s32.totalorder %v447_v8, %v3266_v24  ;;  %vm462_vm10 = vcmp.eq.s32.totalorder %v423_v18, %v3266_v24 }
 0x108   : > { %v851_v33 = vsel %vm850_vm14, %v3328_v53, %v847_v37  ;;  %v857_v46 = vmul.f32 %v3330_v9, %v856_v41  ;;  %vm2918_vm9 = vmpackc.low %vm471_vm8, %vm470_vm4  ;;  %v1043_v53 = vld [vmem:[#allocation2] sm:$0xff]  ;;  %v1049_v37 = vld [vmem:[#allocation2 + $0x48] sm:$0xff] }
 0x109   : > { %v1002_v12 = vmul.f32 %v3706_v23, %v851_v33  ;;  %v1057_v33 = vld [vmem:[#allocation2 + $0x28] sm:$0xff] }
 0x10a   : > { %v861_v60 = vsel %vm860_vm0, %v3330_v9, %v857_v46  ;;  %v441_v39 = vpop.permute.xlu0 %440  ;;  %v1047_v9 = vld [vmem:[#allocation2 + $0x68] sm:$0xff] }
 0x10b   : > { %v1003_v57 = vmul.f32 %v5293_v56, %v861_v60  ;;  %v1018_v38 = vadd.f32 %v1002_v12, %v730_v10  ;;  %vm468_vm14 = vcmp.eq.s32.totalorder %v441_v39, %v3266_v24 }
 0x10d   : > { %v1019_v3 = vadd.f32 %v1003_v57, %v731_v21 }
 0x10e   : > { %v414_v47 = vpop.permute.xlu1 %413  ;;  %v444_v36 = vpop.permute.xlu2 %443 }
 0x10f   : > { %vm459_vm1 = vcmp.eq.s32.totalorder %v414_v47, %v3266_v24  ;;  %v1034_v58 = vpack.c.bf16 %v1019_v3, %v1018_v38  ;;  %vm469_vm15 = vcmp.eq.s32.totalorder %v444_v36, %v3266_v24 }
 0x110   : > { %vm2906_vm5 = vmpackc.low %vm459_vm1, %vm458_vm2 }
 0x111   : > { %1105 = vmatpush.bf16.msra.mxu0 %v1034_v58  ;;  %3208 = vmatpush.bf16.msra.mxu1 %v1034_v58  ;;  %vm2916_vm3 = vmpackc.low %vm469_vm15, %vm468_vm14 }
 0x112   : > { %3209 = vmatpush.bf16.msra.mxu2 %v1034_v58  ;;  %3210 = vmatpush.bf16.msra.mxu3 %v1034_v58  ;;  %v456_v16 = vpop.permute.xlu0 %455 }
 0x113   : > { %vm473_vm0 = vcmp.eq.s32.totalorder %v456_v16, %v3266_v24 }
 0x114   : > { %2907 = vmatmul.msk.bf16.vlgmr.msra.gmra.mxu0 %vm2906_vm5, %v3466_v14 }
 0x115   : > { %2915 = vmatmul.msk.bf16.vlgmr.msra.gmra.mxu2 %vm2914_vm7, %v3466_v14  ;;  %2919 = vmatmul.msk.bf16.vlgmr.msra.gmra.mxu3 %vm2918_vm9, %v3466_v14 }
 0x116   : > { %v426_v15 = vpop.permute.xlu1 %425  ;;  %v417_v23 = vpop.permute.xlu2 %416 }
 0x117   : > { %vm463_vm11 = vcmp.eq.s32.totalorder %v426_v15, %v3266_v24  ;;  %vm460_vm5 = vcmp.eq.s32.totalorder %v417_v23, %v3266_v24 }
 0x118   : > { %vm2910_vm12 = vmpackc.low %vm463_vm11, %vm462_vm10 }
 0x119   : > { %2911 = vmatmul.msk.bf16.vlgmr.msra.gmra.mxu1 %vm2910_vm12, %v3466_v14 }
 0x11a   : > { %v429_v29 = vpop.permute.xlu0 %428 }
 0x11b   : > { %vm464_vm4 = vcmp.eq.s32.totalorder %v429_v29, %v3266_v24 }
 0x11e   : > { %v453_v54 = vpop.permute.xlu1 %452  ;;  %v432_v34 = vpop.permute.xlu2 %431 }
 0x11f   : > { %vm472_vm13 = vcmp.eq.s32.totalorder %v453_v54, %v3266_v24  ;;  %vm465_vm2 = vcmp.eq.s32.totalorder %v432_v34, %v3266_v24 }
 0x120   : > { %vm2920_vm1 = vmpackc.low %vm473_vm0, %vm472_vm13 }
 0x121   : > { %vm2912_vm6 = vmpackc.low %vm465_vm2, %vm464_vm4 }
 0x125   : > { %2917 = vmatmul.msk.bf16.gmra.mxu2 %vm2916_vm3, %v3466_v14  ;;  %2921 = vmatmul.msk.bf16.gmra.mxu3 %vm2920_vm1, %v3466_v14 }
 0x126   : > { %v420_v32 = vpop.permute.xlu1 %419 }
 0x127   : > { %vm461_vm8 = vcmp.eq.s32.totalorder %v420_v32, %v3266_v24 }
 0x128   : > { %vm2908_vm7 = vmpackc.low %vm461_vm8, %vm460_vm5 }
 0x129   : > { %2909 = vmatmul.msk.bf16.gmra.mxu0 %vm2908_vm7, %v3466_v14  ;;  %2913 = vmatmul.msk.bf16.gmra.mxu1 %vm2912_vm6, %v3466_v14 }
 0x191   : > { %v1107_v49 = vpop.f32.mrf.mxu0 }
 0x192   : > { %v1147_v62 = vadd.f32 %v1107_v49, %v1042_v20 }
 0x194   : > { %1163 = vst [vmem:[#allocation2 + $0x30] sm:$0xff] %v1147_v62 }
 0x196   : > { %v1117_v17 = vpop.f32.mrf.mxu1 }
 0x197   : > { %v1151_v7 = vadd.f32 %v1117_v17, %v1046_v5 }
 0x198   : > { %v1127_v22 = vpop.f32.mrf.mxu2  ;;  %v1137_v40 = vpop.f32.mrf.mxu3 }
 0x199   : > { %1167 = vst [vmem:[#allocation2 + $0x50] sm:$0xff] %v1151_v7  ;;  %v1155_v63 = vadd.f32 %v1127_v22, %v1050_v27  ;;  %v1159_v30 = vadd.f32 %v1137_v40, %v1054_v43  ;;  %v1109_v61 = vpop.f32.mrf.mxu0 }
 0x19a   : > { %v1148_v28 = vadd.f32 %v1109_v61, %v1043_v53 }
 0x19b   : > { %1171 = vst [vmem:[#allocation2 + $0x40] sm:$0xff] %v1155_v63 }
 0x19c   : > { %1175 = vst [vmem:[#allocation2 + $0x60] sm:$0xff] %v1159_v30 }
 0x19d   : > { %1164 = vst [vmem:[#allocation2] sm:$0xff] %v1148_v28 }
 0x19e   : > { %v1119_v48 = vpop.f32.mrf.mxu1 }
 0x19f   : > { %v1152_v50 = vadd.f32 %v1119_v48, %v1047_v9 }
 0x1a0   : > { %v1129_v2 = vpop.f32.mrf.mxu2  ;;  %v1139_v45 = vpop.f32.mrf.mxu3 }
 0x1a1   : > { %1168 = vst [vmem:[#allocation2 + $0x68] sm:$0xff] %v1152_v50  ;;  %v1156_v1 = vadd.f32 %v1129_v2, %v1051_v31  ;;  %v1160_v4 = vadd.f32 %v1139_v45, %v1055_v51 }
 0x1a3   : > { %1172 = vst [vmem:[#allocation2 + $0x20] sm:$0xff] %v1156_v1 }
 0x1a4   : > { %1176 = vst [vmem:[#allocation2 + $0x70] sm:$0xff] %v1160_v4 }
 0x1a6   : > { %v1112_v55 = vpop.f32.mrf.mxu0  ;;  %v1122_v0 = vpop.f32.mrf.mxu1 }
 0x1a7   : > { %v1149_v19 = vadd.f32 %v1112_v55, %v1044_v44  ;;  %v1153_v42 = vadd.f32 %v1122_v0, %v1048_v26 }
 0x1a8   : > { %v1132_v59 = vpop.f32.mrf.mxu2  ;;  %v1142_v35 = vpop.f32.mrf.mxu3 }
 0x1a9   : > { %1165 = vst [vmem:[#allocation2 + $0x58] sm:$0xff] %v1149_v19  ;;  %v1157_v8 = vadd.f32 %v1132_v59, %v1052_v13  ;;  %v1161_v11 = vadd.f32 %v1142_v35, %v1056_v52 }
 0x1aa   : > { %1169 = vst [vmem:[#allocation2 + $0x8] sm:$0xff] %v1153_v42 }
 0x1ab   : > { %1173 = vst [vmem:[#allocation2 + $0x10] sm:$0xff] %v1157_v8 }
 0x1ac   : > { %1177 = vst [vmem:[#allocation2 + $0x78] sm:$0xff] %v1161_v11 }
 0x1ae   : > { %v1114_v41 = vpop.f32.mrf.mxu0  ;;  %v1124_v18 = vpop.f32.mrf.mxu1 }
 0x1af   : > { %v1150_v46 = vadd.f32 %v1114_v41, %v1045_v25  ;;  %v1154_v10 = vadd.f32 %v1124_v18, %v1049_v37 }
 0x1b0   : > { %v1134_v12 = vpop.f32.mrf.mxu2  ;;  %v1144_v60 = vpop.f32.mrf.mxu3 }
 0x1b1   : > { %1166 = vst [vmem:[#allocation2 + $0x18] sm:$0xff] %v1150_v46  ;;  %v1158_v21 = vadd.f32 %v1134_v12, %v1053_v6  ;;  %v1162_v56 = vadd.f32 %v1144_v60, %v1057_v33 }
 0x1b2   : > { %1170 = vst [vmem:[#allocation2 + $0x48] sm:$0xff] %v1154_v10 }
 0x1b3   : > { %1174 = vst [vmem:[#allocation2 + $0x38] sm:$0xff] %v1158_v21 }
 0x1b4   : > { %1178 = vst [vmem:[#allocation2 + $0x28] sm:$0xff] %v1162_v56 }
 0x1b5 PF: > { %p2922_p6 = scmp.ne.s32.totalorder %s3454_s27, 1 }
 0x1b7   : > { %1182 = sbr.rel (%p2922_p6) target bundleno = 1087 (0x43f), region = 64 }
 0x1bc   : > { %v1216_v57 = vld [vmem:[%s5228_s4 + $0x70] sm:$0xff]  ;;  %v1214_v38 = vld [vmem:[%s5228_s4 + $0x60] sm:$0xff]  ;;  %v3467_v3 = vmov 0   ;;  %v1215_v47 = vld [vmem:[%s5228_s4 + $0x68] sm:$0xff] }
 0x1bd   : > { %v1212_v24 = vld [vmem:[%s5228_s4 + $0x50] sm:$0xff]  ;;  %3333 = vset.pattern.permute.xlu2 %v3467_v3  ;;  %3332 = vset.pattern.permute.xlu1 %v3467_v3  ;;  %v1217_v39 = vld [vmem:[%s5228_s4 + $0x78] sm:$0xff]  ;;  %v1211_v58 = vld [vmem:[%s5228_s4 + $0x48] sm:$0xff] }
 0x1be   : > { %3331 = vset.pattern.permute.xlu0 %v3467_v3  ;;  %1280 = vperm.xlu1 %3332, %v1214_v38   ;;  %v1213_v36 = vld [vmem:[%s5228_s4 + $0x58] sm:$0xff]  ;;  %v1210_v14 = vld [vmem:[%s5228_s4 + $0x40] sm:$0xff]  ;;  %v1208_v15 = vld [vmem:[%s5228_s4 + $0x30] sm:$0xff] }
 0x1bf   : > { %1290 = vperm.xlu0 %3331, %v1216_v57   ;;  %1270 = vperm.xlu2 %3333, %v1212_v24   ;;  %v1206_v23 = vld [vmem:[%s5228_s4 + $0x20] sm:$0xff]  ;;  %v1209_v16 = vld [vmem:[%s5228_s4 + $0x38] sm:$0xff]  ;;  %v1207_v54 = vld [vmem:[%s5228_s4 + $0x28] sm:$0xff] }
 0x1c0   : > { %v1205_v34 = vld [vmem:[%s5228_s4 + $0x18] sm:$0xff]  ;;  %v3089_v29 = vld [vmem:[%s5230_s6] sm:$0xff]   ;;  %v1204_v53 = vld [vmem:[%s5228_s4 + $0x10] sm:$0xff] }
 0x1c1   : > { %v4513_v32 = vunpack.c.l.bf16 %v3089_v29  ;;  %v4515_v20 = vunpack.c.h.bf16 %v3089_v29  ;;  %v3121_v5 = vld [vmem:[%s5231_s7] sm:$0xff]   ;;  %v1203_v40 = vld [vmem:[%s5228_s4 + $0x8] sm:$0xff]  ;;  %v1196_v63 = vld [vmem:[#allocation2 + $0x10] sm:$0xff] }
 0x1c2   : > { %v4524_v17 = vunpack.c.h.bf16 %v3121_v5  ;;  %v4526_v27 = vunpack.c.l.bf16 %v3121_v5  ;;  %v1202_v30 = vld [vmem:[%s5228_s4] sm:$0xff]  ;;  %v1197_v61 = vld [vmem:[#allocation2 + $0x38] sm:$0xff]  ;;  %v1199_v45 = vld [vmem:[#allocation2 + $0x70] sm:$0xff] }
 0x1c3   : > { %v1509_v49 = vmul.f32 %v4513_v32, %v4513_v32  ;;  %v1510_v62 = vmul.f32 %v4515_v20, %v4515_v20  ;;  %v1198_v2 = vld [vmem:[#allocation2 + $0x60] sm:$0xff]  ;;  %v1200_v1 = vld [vmem:[#allocation2 + $0x78] sm:$0xff]  ;;  %v1201_v44 = vld [vmem:[#allocation2 + $0x28] sm:$0xff] }
 0x1c4   : > { %v2130_v43 = vmul.f32 %v4524_v17, %v4524_v17  ;;  %v2129_v7 = vmul.f32 %v4526_v27, %v4526_v27  ;;  %v1195_v35 = vld [vmem:[#allocation2 + $0x20] sm:$0xff]  ;;  %v4544_v8 = vld [vmem:[%s5230_s6 + $0x28] sm:$0xff]   ;;  %v1190_v21 = vld [vmem:[#allocation2 + $0x50] sm:$0xff] }
 0x1c5   : > { %v1194_v11 = vld [vmem:[#allocation2 + $0x40] sm:$0xff]  ;;  %v4547_v18 = vunpack.c.l.bf16 %v4544_v8  ;;  %v1191_v60 = vld [vmem:[#allocation2 + $0x68] sm:$0xff]  ;;  %v4554_v56 = vld [vmem:[%s5230_s6 + $0x30] sm:$0xff]  }
 0x1c6   : > { %1285 = vperm.xlu1 %3332, %v1215_v47   ;;  %v1192_v57 = vld [vmem:[#allocation2 + $0x8] sm:$0xff]  ;;  %v4574_v5 = vld [vmem:[%s5231_s7 + $0x10] sm:$0xff]  }
 0x1c7   : > { %1295 = vperm.xlu0 %3331, %v1217_v39   ;;  %1275 = vperm.xlu2 %3333, %v1213_v36   ;;  %v1519_v10 = vmul.f32 %v4547_v18, %v4547_v18  ;;  %v1193_v38 = vld [vmem:[#allocation2 + $0x48] sm:$0xff]  ;;  %v4557_v36 = vunpack.c.l.bf16 %v4554_v56 }
 0x1ce   : > { %1265 = vperm.xlu1 %3332, %v1211_v58  }
 0x1cf   : > { %1260 = vperm.xlu0 %3331, %v1210_v14   ;;  %1250 = vperm.xlu2 %3333, %v1208_v15  }
 0x1d6   : > { %1240 = vperm.xlu1 %3332, %v1206_v23  }
 0x1d7   : > { %1255 = vperm.xlu0 %3331, %v1209_v16   ;;  %1245 = vperm.xlu2 %3333, %v1207_v54   ;;  %v1521_v54 = vmul.f32 %v4557_v36, %v4557_v36 }
 0x1de   : > { %1235 = vperm.xlu1 %3332, %v1205_v34   ;;  %v4564_v34 = vld [vmem:[%s5231_s7 + $0x30] sm:$0xff]  }
 0x1df   : > { %v4567_v29 = vunpack.c.h.bf16 %v4564_v34 }
 0x200   : > { %1525 = vadd.xlane.f32.xlu2 %v1509_v49 }
 0x201   : > { %1527 = vadd.xlane.f32.xlu0 %v1510_v62  ;;  %v2142_v62 = vmul.f32 %v4567_v29, %v4567_v29 }
 0x208   : > { %2147 = vadd.xlane.f32.xlu2 %v2130_v43  ;;  %2145 = vadd.xlane.f32.xlu1 %v2129_v7  ;;  %v4577_v43 = vunpack.c.l.bf16 %v4574_v5 }
 0x215   : > { %1230 = vperm.xlu0 %3331, %v1204_v53   ;;  %v2133_v53 = vmul.f32 %v4577_v43, %v4577_v43 }
 0x219   : > { %v1271_v22 = vpop.permute.xlu2 %1270 }
 0x21a   : > { %v1308_v28 = vmul.f32 %v1271_v22, %v1196_v63  ;;  %v4584_v22 = vld [vmem:[%s5230_s6 + $0x38] sm:$0xff]  }
 0x21d   : > { %1225 = vperm.xlu0 %3331, %v1203_v40   ;;  %v4587_v40 = vunpack.c.h.bf16 %v4584_v22 }
 0x220   : > { %1220 = vperm.xlu2 %3333, %v1202_v30   ;;  %v1524_v30 = vmul.f32 %v4587_v40, %v4587_v40 }
 0x221   : > { %v1276_v9 = vpop.permute.xlu2 %1275 }
 0x222   : > { %v1309_v48 = vmul.f32 %v1276_v9, %v1197_v61  ;;  %v4594_v61 = vld [vmem:[%s5230_s6 + $0x18] sm:$0xff]  }
 0x224   : > { %v3076_v31 = vpack.c.bf16 %v1309_v48, %v1308_v28  ;;  %v4597_v28 = vunpack.c.l.bf16 %v4594_v61 }
 0x226   : > { %3170 = vst [vmem:[#allocation3 + $0x8] sm:$0xff] %v3076_v31   ;;  %v1515_v48 = vmul.f32 %v4597_v28, %v4597_v28  ;;  %v4604_v31 = vld [vmem:[%s5231_s7 + $0x18] sm:$0xff]  }
 0x229   : > { %v1251_v42 = vpop.permute.xlu2 %1250 }
 0x22a   : > { %v1304_v58 = vmul.f32 %v1251_v42, %v1192_v57 }
 0x22d   : > { %v2981_v49 = vld [vmem:[#allocation3 + $0x8] sm:$0xff] }
 0x230   : > { %v1281_v51 = vpop.permute.xlu1 %1280 }
 0x231   : > { %v1291_v50 = vpop.permute.xlu0 %1290  ;;  %v1310_v4 = vmul.f32 %v1281_v51, %v1198_v2  ;;  %v1246_v12 = vpop.permute.xlu2 %1245  ;;  %v4607_v51 = vunpack.c.h.bf16 %v4604_v31 }
 0x232   : > { %v1312_v13 = vmul.f32 %v1291_v50, %v1200_v1  ;;  %v1303_v3 = vmul.f32 %v1246_v12, %v1191_v60  ;;  %v3176_v50 = vld [vmem:[%s5230_s6 + $0x20] sm:$0xff]   ;;  %v1188_v12 = vld [vmem:[#allocation2 + $0x58] sm:$0xff]  ;;  %v4650_v60 = vunpack.c.h.bf16 %v4544_v8 }
 0x233   : > { %v4612_v2 = vunpack.c.l.bf16 %v3176_v50 }
 0x238   : > { %v1286_v26 = vpop.permute.xlu1 %1285 }
 0x239   : > { %v1296_v55 = vpop.permute.xlu0 %1295  ;;  %v1311_v0 = vmul.f32 %v1286_v26, %v1199_v45 }
 0x23a   : > { %v1313_v52 = vmul.f32 %v1296_v55, %v1201_v44  ;;  %v2136_v44 = vmul.f32 %v4607_v51, %v4607_v51  ;;  %v4618_v55 = vunpack.c.h.bf16 %v3176_v50 }
 0x23b   : > { %v3081_v19 = vpack.c.bf16 %v1311_v0, %v1310_v4  ;;  %v1517_v4 = vmul.f32 %v4612_v2, %v4612_v2 }
 0x23c   : > { %v3086_v59 = vpack.c.bf16 %v1313_v52, %v1312_v13  ;;  %v1518_v52 = vmul.f32 %v4618_v55, %v4618_v55 }
 0x23d   : > { %3171 = vst [vmem:[#allocation3 + $0x38] sm:$0xff] %v3081_v19   ;;  %1541 = vadd.xlane.f32.xlu1 %v1517_v4 }
 0x23e   : > { %3172 = vst [vmem:[#allocation3 + $0x30] sm:$0xff] %v3086_v59  }
 0x240   : > { %v1266_v25 = vpop.permute.xlu1 %1265 }
 0x241   : > { %v1307_v37 = vmul.f32 %v1266_v25, %v1195_v35  ;;  %v1261_v41 = vpop.permute.xlu0 %1260 }
 0x242   : > { %v1306_v6 = vmul.f32 %v1261_v41, %v1194_v11  ;;  %v3183_v11 = vld [vmem:[%s5231_s7 + $0x20] sm:$0xff]  }
 0x244   : > { %v3071_v33 = vpack.c.bf16 %v1307_v37, %v1306_v6  ;;  %v2982_v23 = vld [vmem:[#allocation3 + $0x38] sm:$0xff]  ;;  %v4639_v37 = vunpack.c.l.bf16 %v3183_v11 }
 0x245   : > { %v2983_v46 = vld [vmem:[#allocation3 + $0x30] sm:$0xff]  ;;  %1543 = vadd.xlane.f32.xlu1 %v1518_v52 }
 0x246   : > { %3169 = vst [vmem:[#allocation3 + $0x18] sm:$0xff] %v3071_v33   ;;  %1805 = vmatpush.bf16.xpose.msra.mxu0 %v2983_v46  ;;  %3211 = vmatpush.bf16.xpose.msra.mxu2 %v2983_v46  ;;  %v2137_v33 = vmul.f32 %v4639_v37, %v4639_v37 }
 0x247   : > { %2377 = vmatpush.bf16.xpose.msra.mxu1 %v2983_v46  ;;  %3219 = vmatpush.bf16.xpose.msra.mxu3 %v2983_v46 }
 0x248   : > { %v1241_v24 = vpop.permute.xlu1 %1240 }
 0x249   : > { %v1256_v47 = vpop.permute.xlu0 %1255  ;;  %v1302_v39 = vmul.f32 %v1241_v24, %v1190_v21  ;;  %1545 = vadd.xlane.f32.xlu2 %v1519_v10  ;;  %v1189_v10 = vld [vmem:[#allocation2 + $0x18] sm:$0xff]  ;;  %v4652_v21 = vunpack.c.h.bf16 %v3183_v11 }
 0x24a   : > { %v1305_v14 = vmul.f32 %v1256_v47, %v1193_v38 }
 0x24b   : > { %v3061_v15 = vpack.c.bf16 %v1303_v3, %v1302_v39  ;;  %v2138_v8 = vmul.f32 %v4652_v21, %v4652_v21 }
 0x24c   : > { %v3066_v16 = vpack.c.bf16 %v1305_v14, %v1304_v58 }
 0x24d   : > { %3167 = vst [vmem:[#allocation3 + $0x10] sm:$0xff] %v3061_v15   ;;  %v2980_v7 = vld [vmem:[#allocation3 + $0x18] sm:$0xff]  ;;  %2161 = vadd.xlane.f32.xlu1 %v2137_v33  ;;  %v1520_v15 = vmul.f32 %v4650_v60, %v4650_v60  ;;  %2163 = vadd.xlane.f32.xlu0 %v2138_v8 }
 0x24e   : > { %3168 = vst [vmem:[#allocation3 + $0x20] sm:$0xff] %v3066_v16   ;;  %1806 = vmatpush.bf16.xpose.msra.mxu0 %v2982_v23  ;;  %3212 = vmatpush.bf16.xpose.msra.mxu2 %v2982_v23 }
 0x24f   : > { %2378 = vmatpush.bf16.xpose.msra.mxu1 %v2982_v23  ;;  %3220 = vmatpush.bf16.xpose.msra.mxu3 %v2982_v23 }
 0x250   : > { %v1236_v45 = vpop.permute.xlu1 %1235 }
 0x251   : > { %1549 = vadd.xlane.f32.xlu2 %v1521_v54  ;;  %v1301_v3 = vmul.f32 %v1236_v45, %v1189_v10 }
 0x254   : > { %v2978_v9 = vld [vmem:[#allocation3 + $0x10] sm:$0xff] }
 0x255   : > { %v2979_v63 = vld [vmem:[#allocation3 + $0x20] sm:$0xff]  ;;  %1547 = vadd.xlane.f32.xlu1 %v1520_v15 }
 0x256   : > { %1807 = vmatpush.bf16.xpose.msra.mxu0 %v2981_v49  ;;  %3213 = vmatpush.bf16.xpose.msra.mxu2 %v2981_v49 }
 0x257   : > { %2379 = vmatpush.bf16.xpose.msra.mxu1 %v2981_v49  ;;  %3221 = vmatpush.bf16.xpose.msra.mxu3 %v2981_v49 }
 0x259   : > { %2171 = vadd.xlane.f32.xlu2 %v2142_v62  ;;  %v3184_v62 = vld [vmem:[%s5231_s7 + $0x28] sm:$0xff]  }
 0x25a   : > { %v4676_v45 = vunpack.c.l.bf16 %v3184_v62 }
 0x25c   : > { %v2139_v33 = vmul.f32 %v4676_v45, %v4676_v45 }
 0x25e   : > { %1808 = vmatpush.bf16.xpose.msra.mxu0 %v2980_v7  ;;  %3214 = vmatpush.bf16.xpose.msra.mxu2 %v2980_v7 }
 0x25f   : > { %2380 = vmatpush.bf16.xpose.msra.mxu1 %v2980_v7  ;;  %3222 = vmatpush.bf16.xpose.msra.mxu3 %v2980_v7 }
 0x260   : > { %2165 = vadd.xlane.f32.xlu1 %v2139_v33 }
 0x261   : > { %2153 = vadd.xlane.f32.xlu2 %v2133_v53  ;;  %v1186_v53 = vld [vmem:[#allocation2 + $0x30] sm:$0xff] }
 0x266   : > { %1809 = vmatpush.bf16.xpose.msra.mxu0 %v2979_v63  ;;  %3215 = vmatpush.bf16.xpose.msra.mxu2 %v2979_v63 }
 0x267   : > { %2381 = vmatpush.bf16.xpose.msra.mxu1 %v2979_v63  ;;  %3223 = vmatpush.bf16.xpose.msra.mxu3 %v2979_v63  ;;  %v1187_v63 = vld [vmem:[#allocation2] sm:$0xff] }
 0x269   : > { %1555 = vadd.xlane.f32.xlu2 %v1524_v30  ;;  %v1363_v30 = vld [vmem:[%s5227_s3] sm:$0xff] }
 0x26e   : > { %1810 = vmatpush.bf16.xpose.msra.mxu0 %v2978_v9  ;;  %3216 = vmatpush.bf16.xpose.msra.mxu2 %v2978_v9 }
 0x26f   : > { %2382 = vmatpush.bf16.xpose.msra.mxu1 %v2978_v9  ;;  %3224 = vmatpush.bf16.xpose.msra.mxu3 %v2978_v9 }
 0x271   : > { %1537 = vadd.xlane.f32.xlu2 %v1515_v48 }
 0x273   : > { %v1526_v1 = vpop.xlane.xlu2 %1525 }
 0x274   : > { %v1528_v26 = vpop.xlane.xlu0 %1527  ;;  %v4620_v0 = vmax.f32 %v1526_v1, 1e-24 }
 0x275   : > { %v4622_v13 = vmax.f32 %v1528_v26, 1e-24 }
 0x276   : > { %3336 = vrsqrt.f32 %v4620_v0  ;;  %vm1579_vm9 = vweird.f32 %v4620_v0 }
 0x277   : > { %3338 = vrsqrt.f32 %v4622_v13  ;;  %vm1589_vm1 = vweird.f32 %v4622_v13 }
 0x279   : > { %2159 = vadd.xlane.f32.xlu2 %v2136_v44 }
 0x27b   : > { %v2148_v19 = vpop.xlane.xlu2 %2147  ;;  %v2146_v42 = vpop.xlane.xlu1 %2145 }
 0x27c   : > { %v4627_v59 = vmax.f32 %v2148_v19, 1e-24  ;;  %v4629_v35 = vmax.f32 %v2146_v42, 1e-24  ;;  %v4637_v25 = vpop.eup %3336 }
 0x27d   : > { %v4641_v41 = vpop.eup %3338  ;;  %v1574_v57 = vmul.f32 %v4637_v25, %v4620_v0  ;;  %vm1580_vm10 = vweird.f32 %v4637_v25 }
 0x27e   : > { %3340 = vrsqrt.f32 %v4627_v59  ;;  %v1584_v38 = vmul.f32 %v4641_v41, %v4622_v13  ;;  %vm2199_vm11 = vweird.f32 %v4629_v35  ;;  %vm1590_vm13 = vweird.f32 %v4641_v41  ;;  %vm4687_vm14 = vmor %vm1579_vm9, %vm1580_vm10 }
 0x27f   : > { %3342 = vrsqrt.f32 %v4629_v35  ;;  %v1575_v23 = vmul.f32 %v4637_v25, %v1574_v57  ;;  %vm2209_vm15 = vweird.f32 %v4627_v59  ;;  %vm1591_vm3 = vmor %vm1589_vm1, %vm1590_vm13 }
 0x280   : > { %v1585_v16 = vmul.f32 %v4641_v41, %v1584_v38 }
 0x281   : > { %v1576_v9 = vmul.f32 0.5, %v1575_v23 }
 0x282   : > { %v1586_v48 = vmul.f32 0.5, %v1585_v16 }
 0x283   : > { %v1221_v7 = vpop.permute.xlu2 %1220  ;;  %v1577_v19 = vsub.f32 1.5, %v1576_v9 }
 0x284   : > { %v4643_v6 = vpop.eup %3340  ;;  %v1298_v44 = vmul.f32 %v1221_v7, %v1186_v53  ;;  %v1587_v42 = vsub.f32 1.5, %v1586_v48 }
 0x285   : > { %v4647_v46 = vpop.eup %3342  ;;  %v2204_v47 = vmul.f32 %v4643_v6, %v4627_v59  ;;  %v1578_v57 = vmul.f32 %v4637_v25, %v1577_v19  ;;  %vm2210_vm0 = vweird.f32 %v4643_v6 }
 0x286   : > { %v2194_v39 = vmul.f32 %v4647_v46, %v4629_v35  ;;  %vm2200_vm12 = vweird.f32 %v4647_v46  ;;  %v1588_v38 = vmul.f32 %v4641_v41, %v1587_v42  ;;  %vm2211_vm4 = vmor %vm2209_vm15, %vm2210_vm0  ;;  %v3186_v42 = vld [vmem:[%s5231_s7 + $0x38] sm:$0xff]  }
 0x287   : > { %v1231_v24 = vpop.permute.xlu0 %1230  ;;  %v2205_v54 = vmul.f32 %v4643_v6, %v2204_v47  ;;  %vm4696_vm2 = vmor %vm2199_vm11, %vm2200_vm12  ;;  %v4700_v47 = vunpack.c.h.bf16 %v3184_v62  ;;  %v1582_v59 = vsel %vm4687_vm14, %v4637_v25, %v1578_v57  ;;  %v4774_v33 = vunpack.c.l.bf16 %v3186_v42 }
 0x288   : > { %v1300_v58 = vmul.f32 %v1231_v24, %v1188_v12  ;;  %v2195_v49 = vmul.f32 %v4647_v46, %v2194_v39  ;;  %v1733_v15 = vmul.f32 %v4513_v32, %v1582_v59 }
 0x289   : > { %v2206_v1 = vmul.f32 0.5, %v2205_v54 }
 0x28a   : > { %v3056_v14 = vpack.c.bf16 %v1301_v3, %v1300_v58  ;;  %v2196_v4 = vmul.f32 0.5, %v2195_v49  ;;  %v1592_v58 = vsel %vm1591_vm3, %v4641_v41, %v1588_v38 }
 0x28b   : > { %v2207_v10 = vsub.f32 1.5, %v2206_v1  ;;  %v1734_v23 = vmul.f32 %v4515_v20, %v1592_v58 }
 0x28c   : > { %3166 = vst [vmem:[#allocation3] sm:$0xff] %v3056_v14   ;;  %v2197_v12 = vsub.f32 1.5, %v2196_v4  ;;  %v2140_v14 = vmul.f32 %v4700_v47, %v4700_v47 }
 0x28d   : > { %v2208_v35 = vmul.f32 %v4643_v6, %v2207_v10  ;;  %v4781_v10 = vunpack.c.l.bf16 %v4604_v31 }
 0x28e   : > { %v2198_v0 = vmul.f32 %v4647_v46, %v2197_v12  ;;  %2167 = vadd.xlane.f32.xlu1 %v2140_v14  ;;  %v4784_v12 = vunpack.c.h.bf16 %v4594_v61 }
 0x28f   : > { %v1226_v50 = vpop.permute.xlu0 %1225  ;;  %v2212_v13 = vsel %vm2211_vm4, %v4643_v6, %v2208_v35  ;;  %v3173_v6 = vld [vmem:[%s5230_s6 + $0x8] sm:$0xff]   ;;  %v2135_v57 = vmul.f32 %v4781_v10, %v4781_v10 }
 0x290   : > { %v1299_v26 = vmul.f32 %v1226_v50, %v1187_v63  ;;  %v2202_v8 = vsel %vm4696_vm2, %v4647_v46, %v2198_v0  ;;  %v2354_v41 = vmul.f32 %v4524_v17, %v2212_v13  ;;  %v1749_v46 = vpack.c.bf16 %v1734_v23, %v1733_v15  ;;  %v3180_v17 = vld [vmem:[%s5231_s7 + $0x8] sm:$0xff]   ;;  %v3174_v50 = vld [vmem:[%s5230_s6 + $0x10] sm:$0xff]  }
 0x291   : > { %1381 = vperm.xlu2 %3333, %v1363_v30   ;;  %v2353_v25 = vmul.f32 %v4526_v27, %v2202_v8  ;;  %v4719_v16 = vunpack.c.l.bf16 %v3173_v6  ;;  %v4723_v32 = vunpack.c.h.bf16 %v3173_v6  ;;  %v4730_v27 = vunpack.c.h.bf16 %v3180_v17 }
 0x292   : > { %v3051_v52 = vpack.c.bf16 %v1299_v26, %v1298_v44  ;;  %v4732_v62 = vunpack.c.l.bf16 %v3180_v17  ;;  %v4739_v63 = vunpack.c.l.bf16 %v4564_v34  ;;  %v4742_v30 = vunpack.c.h.bf16 %v4554_v56 }
 0x293   : > { %v2977_v11 = vld [vmem:[#allocation3] sm:$0xff]  ;;  %v2369_v54 = vpack.c.bf16 %v2354_v41, %v2353_v25  ;;  %v1511_v49 = vmul.f32 %v4719_v16, %v4719_v16  ;;  %v1512_v20 = vmul.f32 %v4723_v32, %v4723_v32  ;;  %v2132_v7 = vmul.f32 %v4730_v27, %v4730_v27 }
 0x294   : > { %3052 = vst [vmem:[#allocation3 + $0x28] sm:$0xff] %v3051_v52   ;;  %1811 = vmatpush.bf16.xpose.msra.mxu0 %v2977_v11  ;;  %3217 = vmatpush.bf16.xpose.msra.mxu2 %v2977_v11  ;;  %v2131_v53 = vmul.f32 %v4732_v62, %v4732_v62  ;;  %v2141_v9 = vmul.f32 %v4739_v63, %v4739_v63  ;;  %v4751_v1 = vunpack.c.h.bf16 %v3174_v50  ;;  %v4753_v4 = vunpack.c.l.bf16 %v3174_v50 }
 0x295   : > { %2383 = vmatpush.bf16.xpose.msra.mxu1 %v2977_v11  ;;  %3225 = vmatpush.bf16.xpose.msra.mxu3 %v2977_v11  ;;  %v1522_v48 = vmul.f32 %v4742_v30, %v4742_v30  ;;  %v4760_v44 = vunpack.c.l.bf16 %v4584_v22  ;;  %v4763_v26 = vunpack.c.h.bf16 %v4574_v5  ;;  %v4772_v11 = vunpack.c.h.bf16 %v3186_v42 }
 0x296   : > { %1529 = vadd.xlane.f32.xlu1 %v1511_v49  ;;  %2149 = vadd.xlane.f32.xlu0 %v2131_v53  ;;  %v1514_v56 = vmul.f32 %v4751_v1, %v4751_v1  ;;  %v1513_v34 = vmul.f32 %v4753_v4, %v4753_v4  ;;  %v2143_v22 = vmul.f32 %v4774_v33, %v4774_v33 }
 0x297   : > { %v1523_v52 = vmul.f32 %v4760_v44, %v4760_v44  ;;  %v2134_v19 = vmul.f32 %v4763_v26, %v4763_v26  ;;  %v2144_v5 = vmul.f32 %v4772_v11, %v4772_v11  ;;  %v1516_v38 = vmul.f32 %v4784_v12, %v4784_v12 }
 0x29b   : > { %v2976_v39 = vld [vmem:[#allocation3 + $0x28] sm:$0xff] }
 0x29c   : > { %1812 = vmatpush.bf16.xpose.msra.mxu0 %v2976_v39  ;;  %3218 = vmatpush.bf16.xpose.msra.mxu2 %v2976_v39 }
 0x29d   : > { %2384 = vmatpush.bf16.xpose.msra.mxu1 %v2976_v39  ;;  %3226 = vmatpush.bf16.xpose.msra.mxu3 %v2976_v39 }
 0x29e   : > { %1531 = vadd.xlane.f32.xlu1 %v1512_v20  ;;  %1551 = vadd.xlane.f32.xlu0 %v1522_v48 }
 0x2a3   : > { %1813 = vmatmul.bf16.vlgmr.msra.gmra.mxu0 %v1749_v46 }
 0x2a4   : > { %2385 = vmatmul.bf16.vlgmr.msra.gmra.mxu1 %v2369_v54 }
 0x2a6   : > { %2151 = vadd.xlane.f32.xlu1 %v2132_v7  ;;  %1533 = vadd.xlane.f32.xlu0 %v1513_v34 }
 0x2ae   : > { %2169 = vadd.xlane.f32.xlu1 %v2141_v9  ;;  %2155 = vadd.xlane.f32.xlu0 %v2134_v19 }
 0x2b0   : > { %v1542_v24 = vpop.xlane.xlu1 %1541 }
 0x2b1   : > { %v1565_v0 = vmax.f32 %v1542_v24, 1e-24 }
 0x2b3   : > { %3344 = vrsqrt.f32 %v1565_v0  ;;  %vm1659_vm5 = vweird.f32 %v1565_v0 }
 0x2b6   : > { %1535 = vadd.xlane.f32.xlu1 %v1514_v56  ;;  %2173 = vadd.xlane.f32.xlu0 %v2143_v22 }
 0x2b8   : > { %v1544_v35 = vpop.xlane.xlu1 %1543 }
 0x2b9   : > { %v3345_v3 = vpop.eup %3344  ;;  %v1566_v39 = vmax.f32 %v1544_v35, 1e-24 }
 0x2ba   : > { %v1654_v59 = vmul.f32 %v3345_v3, %v1565_v0  ;;  %vm1660_vm6 = vweird.f32 %v3345_v3 }
 0x2bb   : > { %3346 = vrsqrt.f32 %v1566_v39  ;;  %vm1669_vm8 = vweird.f32 %v1566_v39  ;;  %vm4795_vm9 = vmor %vm1659_vm5, %vm1660_vm6 }
 0x2bc   : > { %v1546_v31 = vpop.xlane.xlu2 %1545  ;;  %v1655_v61 = vmul.f32 %v3345_v3, %v1654_v59 }
 0x2bd   : > { %v4790_v58 = vmax.f32 %v1546_v31, 1e-24 }
 0x2be   : > { %1553 = vadd.xlane.f32.xlu1 %v1523_v52  ;;  %1539 = vadd.xlane.f32.xlu0 %v1516_v38  ;;  %v1656_v15 = vmul.f32 0.5, %v1655_v61 }
 0x2bf   : > { %3348 = vrsqrt.f32 %v4790_v58  ;;  %vm1679_vm0 = vweird.f32 %v4790_v58 }
 0x2c0   : > { %v2162_v8 = vpop.xlane.xlu1 %2161  ;;  %v2164_v41 = vpop.xlane.xlu0 %2163  ;;  %v1657_v46 = vsub.f32 1.5, %v1656_v15 }
 0x2c1   : > { %v3347_v13 = vpop.eup %3346  ;;  %v2185_v14 = vmax.f32 %v2162_v8, 1e-24  ;;  %v2186_v49 = vmax.f32 %v2164_v41, 1e-24 }
 0x2c2   : > { %v1664_v23 = vmul.f32 %v3347_v13, %v1566_v39  ;;  %vm1670_vm7 = vweird.f32 %v3347_v13  ;;  %v1658_v56 = vmul.f32 %v3345_v3, %v1657_v46 }
 0x2c3   : > { %3350 = vrsqrt.f32 %v2185_v14  ;;  %vm1671_vm10 = vmor %vm1669_vm8, %vm1670_vm7  ;;  %vm2279_vm11 = vweird.f32 %v2185_v14  ;;  %vm2289_vm14 = vweird.f32 %v2186_v49 }
 0x2c4   : > { %v1665_v25 = vmul.f32 %v3347_v13, %v1664_v23  ;;  %3352 = vrsqrt.f32 %v2186_v49  ;;  %v1662_v19 = vsel %vm4795_vm9, %v3345_v3, %v1658_v56 }
 0x2c5   : > { %v4793_v6 = vpop.eup %3348  ;;  %v1741_v22 = vmul.f32 %v4612_v2, %v1662_v19 }
 0x2c6   : > { %2175 = vadd.xlane.f32.xlu1 %v2144_v5  ;;  %v1666_v54 = vmul.f32 0.5, %v1665_v25  ;;  %v1674_v9 = vmul.f32 %v4793_v6, %v4790_v58  ;;  %vm1680_vm1 = vweird.f32 %v4793_v6 }
 0x2c7   : > { %vm4814_vm5 = vmor %vm1679_vm0, %vm1680_vm1 }
 0x2c8   : > { %v1667_v17 = vsub.f32 1.5, %v1666_v54  ;;  %v1548_v7 = vpop.xlane.xlu1 %1547  ;;  %v1675_v5 = vmul.f32 %v4793_v6, %v1674_v9  ;;  %v1550_v54 = vpop.xlane.xlu2 %1549 }
 0x2c9   : > { %v3351_v53 = vpop.eup %3350  ;;  %v1568_v48 = vmax.f32 %v1548_v7, 1e-24 }
 0x2ca   : > { %v2274_v50 = vmul.f32 %v3351_v53, %v2185_v14  ;;  %v1668_v34 = vmul.f32 %v3347_v13, %v1667_v17  ;;  %v3353_v38 = vpop.eup %3352  ;;  %vm2280_vm12 = vweird.f32 %v3351_v53  ;;  %v1676_v31 = vmul.f32 0.5, %v1675_v5 }
 0x2cb   : > { %3354 = vrsqrt.f32 %v1568_v48  ;;  %v2284_v0 = vmul.f32 %v3353_v38, %v2186_v49  ;;  %vm4806_vm13 = vmor %vm2279_vm11, %vm2280_vm12  ;;  %vm2290_vm15 = vweird.f32 %v3353_v38  ;;  %vm1689_vm2 = vweird.f32 %v1568_v48 }
 0x2cc   : > { %v2275_v52 = vmul.f32 %v3351_v53, %v2274_v50  ;;  %v1672_v42 = vsel %vm1671_vm10, %v3347_v13, %v1668_v34  ;;  %v1677_v23 = vsub.f32 1.5, %v1676_v31  ;;  %vm2291_vm4 = vmor %vm2289_vm14, %vm2290_vm15 }
 0x2cd   : > { %v2285_v61 = vmul.f32 %v3353_v38, %v2284_v0 }
 0x2ce   : > { %2157 = vadd.xlane.f32.xlu1 %v2135_v57  ;;  %v1742_v57 = vmul.f32 %v4618_v55, %v1672_v42  ;;  %v2276_v24 = vmul.f32 0.5, %v2275_v52  ;;  %v1678_v50 = vmul.f32 %v4793_v6, %v1677_v23 }
 0x2cf   : > { %v2286_v55 = vmul.f32 0.5, %v2285_v61 }
 0x2d0   : > { %v1753_v35 = vpack.c.bf16 %v1742_v57, %v1741_v22  ;;  %v2277_v39 = vsub.f32 1.5, %v2276_v24  ;;  %v1682_v19 = vsel %vm4814_vm5, %v4793_v6, %v1678_v50  ;;  %v2172_v0 = vpop.xlane.xlu2 %2171 }
 0x2d1   : > { %v3355_v59 = vpop.eup %3354  ;;  %v2287_v25 = vsub.f32 1.5, %v2286_v55 }
 0x2d2   : > { %1833 = vmatmul.bf16.vlgmr.msra.gmra.mxu2 %v1753_v35  ;;  %v1684_v13 = vmul.f32 %v3355_v59, %v1568_v48  ;;  %v2278_v15 = vmul.f32 %v3351_v53, %v2277_v39  ;;  %vm1690_vm3 = vweird.f32 %v3355_v59 }
 0x2d3   : > { %v2166_v8 = vpop.xlane.xlu1 %2165  ;;  %v2288_v20 = vmul.f32 %v3353_v38, %v2287_v25  ;;  %vm1691_vm6 = vmor %vm1689_vm2, %vm1690_vm3 }
 0x2d4   : > { %v2187_v2 = vmax.f32 %v2166_v8, 1e-24  ;;  %v1685_v14 = vmul.f32 %v3355_v59, %v1684_v13  ;;  %v2282_v41 = vsel %vm4806_vm13, %v3351_v53, %v2278_v15 }
 0x2d5   : > { %v2361_v17 = vmul.f32 %v4639_v37, %v2282_v41  ;;  %v2292_v9 = vsel %vm2291_vm4, %v3353_v38, %v2288_v20  ;;  %v1743_v37 = vmul.f32 %v4547_v18, %v1682_v19 }
 0x2d6   : > { %3356 = vrsqrt.f32 %v2187_v2  ;;  %v1686_v46 = vmul.f32 0.5, %v1685_v14  ;;  %v2362_v48 = vmul.f32 %v4652_v21, %v2292_v9  ;;  %vm2299_vm8 = vweird.f32 %v2187_v2 }
 0x2d8   : > { %v1687_v58 = vsub.f32 1.5, %v1686_v46  ;;  %v2373_v42 = vpack.c.bf16 %v2362_v48, %v2361_v17  ;;  %v2154_v46 = vpop.xlane.xlu2 %2153  ;;  %v4848_v17 = vmax.f32 %v1550_v54, 1e-24 }
 0x2d9   : > { %v4855_v54 = vmax.f32 %v2154_v46, 1e-24 }
 0x2da   : > { %v1688_v34 = vmul.f32 %v3355_v59, %v1687_v58  ;;  %2405 = vmatmul.bf16.vlgmr.msra.gmra.mxu3 %v2373_v42  ;;  %vm1699_vm3 = vweird.f32 %v4848_v17 }
 0x2dc   : > { %v3357_v56 = vpop.eup %3356  ;;  %v1692_v5 = vsel %vm1691_vm6, %v3355_v59, %v1688_v34  ;;  %v3335_v59 = vld [vmem:[%s5229_s5] ss:$0 sm:$0xff] }
 0x2dd   : > { %v2294_v52 = vmul.f32 %v3357_v56, %v2187_v2  ;;  %v1744_v57 = vmul.f32 %v4650_v60, %v1692_v5  ;;  %vm2300_vm7 = vweird.f32 %v3357_v56 }
 0x2de   : > { %vm4829_vm9 = vmor %vm2299_vm8, %vm2300_vm7 }
 0x2df   : > { %v2295_v22 = vmul.f32 %v3357_v56, %v2294_v52  ;;  %v1754_v24 = vpack.c.bf16 %v1744_v57, %v1743_v37 }
 0x2e0   : > { %v1556_v5 = vpop.xlane.xlu2 %1555 }
 0x2e1   : > { %v2296_v38 = vmul.f32 0.5, %v2295_v22  ;;  %v4857_v37 = vmax.f32 %v1556_v5, 1e-24 }
 0x2e2   : > { %1838 = vmatmul.bf16.gmra.mxu2 %v1754_v24 }
 0x2e3   : > { %v2297_v35 = vsub.f32 1.5, %v2296_v38 }
 0x2e5   : > { %v2298_v61 = vmul.f32 %v3357_v56, %v2297_v35 }
 0x2e7   : > { %v2302_v14 = vsel %vm4829_vm9, %v3357_v56, %v2298_v61  ;;  %v4851_v56 = vmax.f32 %v2172_v0, 1e-24 }
 0x2e8   : > { %v2363_v58 = vmul.f32 %v4676_v45, %v2302_v14 }
 0x2e9   : > { %vm2329_vm4 = vweird.f32 %v4851_v56 }
 0x301   : > { %v2168_v7 = vpop.xlane.xlu1 %2167 }
 0x302   : > { %v2188_v53 = vmax.f32 %v2168_v7, 1e-24 }
 0x304   : > { %3358 = vrsqrt.f32 %v2188_v53  ;;  %vm2309_vm10 = vweird.f32 %v2188_v53 }
 0x309   : > { %v1530_v21 = vpop.xlane.xlu1 %1529  ;;  %v2150_v35 = vpop.xlane.xlu0 %2149 }
 0x30a   : > { %v3359_v39 = vpop.eup %3358  ;;  %v1559_v31 = vmax.f32 %v1530_v21, 1e-24 }
 0x30b   : > { %v2304_v6 = vmul.f32 %v3359_v39, %v2188_v53  ;;  %vm2310_vm11 = vweird.f32 %v3359_v39 }
 0x30c   : > { %3360 = vrsqrt.f32 %v1559_v31  ;;  %vm2311_vm12 = vmor %vm2309_vm10, %vm2310_vm11  ;;  %vm1599_vm13 = vweird.f32 %v1559_v31 }
 0x30d   : > { %v2305_v18 = vmul.f32 %v3359_v39, %v2304_v6  ;;  %v4868_v6 = vmax.f32 %v2150_v35, 1e-24 }
 0x30f   : > { %v2306_v8 = vmul.f32 0.5, %v2305_v18  ;;  %vm2219_vm8 = vweird.f32 %v4868_v6 }
 0x311   : > { %v2307_v15 = vsub.f32 1.5, %v2306_v8  ;;  %v1532_v55 = vpop.xlane.xlu1 %1531 }
 0x312   : > { %v3361_v23 = vpop.eup %3360  ;;  %v1560_v41 = vmax.f32 %v1532_v55, 1e-24 }
 0x313   : > { %v1594_v20 = vmul.f32 %v3361_v23, %v1559_v31  ;;  %v2308_v49 = vmul.f32 %v3359_v39, %v2307_v15  ;;  %vm1600_vm14 = vweird.f32 %v3361_v23 }
 0x314   : > { %3362 = vrsqrt.f32 %v1560_v41  ;;  %vm4859_vm15 = vmor %vm1599_vm13, %vm1600_vm14  ;;  %vm1609_vm0 = vweird.f32 %v1560_v41 }
 0x315   : > { %v1595_v7 = vmul.f32 %v3361_v23, %v1594_v20  ;;  %v2312_v9 = vsel %vm2311_vm12, %v3359_v39, %v2308_v49  ;;  %3364 = vrsqrt.f32 %v4848_v17  ;;  %v1552_v49 = vpop.xlane.xlu0 %1551 }
 0x316   : > { %v2364_v50 = vmul.f32 %v4700_v47, %v2312_v9  ;;  %3366 = vrsqrt.f32 %v4851_v56 }
 0x317   : > { %v1596_v53 = vmul.f32 0.5, %v1595_v7  ;;  %3368 = vrsqrt.f32 %v4855_v54 }
 0x318   : > { %v2374_v34 = vpack.c.bf16 %v2364_v50, %v2363_v58  ;;  %3370 = vrsqrt.f32 %v4857_v37  ;;  %v4888_v50 = vmax.f32 %v1552_v49, 1e-24 }
 0x319   : > { %v1597_v19 = vsub.f32 1.5, %v1596_v53  ;;  %v2152_v0 = vpop.xlane.xlu1 %2151 }
 0x31a   : > { %v3363_v42 = vpop.eup %3362  ;;  %2410 = vmatmul.bf16.gmra.mxu3 %v2374_v34  ;;  %v2180_v31 = vmax.f32 %v2152_v0, 1e-24 }
 0x31b   : > { %v1604_v45 = vmul.f32 %v3363_v42, %v1560_v41  ;;  %v1598_v22 = vmul.f32 %v3361_v23, %v1597_v19  ;;  %v4863_v38 = vpop.eup %3364  ;;  %vm1610_vm1 = vweird.f32 %v3363_v42 }
 0x31c   : > { %v4866_v21 = vpop.eup %3366  ;;  %v1694_v18 = vmul.f32 %v4863_v38, %v4848_v17  ;;  %vm1611_vm2 = vmor %vm1609_vm0, %vm1610_vm1  ;;  %3372 = vrsqrt.f32 %v2180_v31  ;;  %vm2229_vm5 = vweird.f32 %v2180_v31  ;;  %vm1700_vm11 = vweird.f32 %v4863_v38 }
 0x31d   : > { %v1605_v47 = vmul.f32 %v3363_v42, %v1604_v45  ;;  %v2324_v60 = vmul.f32 %v4866_v21, %v4851_v56  ;;  %3374 = vrsqrt.f32 %v4868_v6  ;;  %v4879_v55 = vpop.eup %3368  ;;  %vm2330_vm9 = vweird.f32 %v4866_v21  ;;  %vm4969_vm14 = vmor %vm1699_vm3, %vm1700_vm11 }
 0x31e   : > { %v1695_v14 = vmul.f32 %v4863_v38, %v1694_v18  ;;  %v4883_v41 = vpop.eup %3370  ;;  %v1534_v18 = vpop.xlane.xlu0 %1533  ;;  %vm4949_vm13 = vmor %vm2329_vm4, %vm2330_vm9  ;;  %vm1709_vm1 = vweird.f32 %v4888_v50  ;;  %vm1729_vm11 = vweird.f32 %v4857_v37 }
 0x31f   : > { %v1606_v24 = vmul.f32 0.5, %v1605_v47  ;;  %v2325_v46 = vmul.f32 %v4866_v21, %v2324_v60  ;;  %v1724_v45 = vmul.f32 %v4883_v41, %v4857_v37 }
 0x320   : > { %v4833_v3 = vpop.f32.mrf.mxu0  ;;  %v1696_v53 = vmul.f32 0.5, %v1695_v14  ;;  %v4913_v14 = vmax.f32 %v1534_v18, 1e-24 }
 0x321   : > { %v4835_v13 = vpop.f32.mrf.mxu1  ;;  %v4838_v2 = vadd.f32 %v3335_v59, %v4833_v3  ;;  %v1607_v39 = vsub.f32 1.5, %v1606_v24  ;;  %v2170_v20 = vpop.xlane.xlu1 %2169  ;;  %v2326_v19 = vmul.f32 0.5, %v2325_v46  ;;  %v1725_v60 = vmul.f32 %v4883_v41, %v1724_v45 }
 0x322   : > { %v4843_v25 = vadd.f32 %v3335_v59, %v4835_v13  ;;  %v1602_v59 = vsel %vm4859_vm15, %v3361_v23, %v1598_v22  ;;  %v3373_v7 = vpop.eup %3372  ;;  %v4886_v9 = vmax.f32 %v2170_v20, 1e-24  ;;  %v1697_v47 = vsub.f32 1.5, %v1696_v53 }
 0x323   : > { %1921 = vmax.xlane.f32.xlu0 %v4838_v2  ;;  %v1608_v61 = vmul.f32 %v3363_v42, %v1607_v39  ;;  %v1735_v8 = vmul.f32 %v4719_v16, %v1602_v59  ;;  %v4890_v16 = vpop.eup %3374  ;;  %v2224_v34 = vmul.f32 %v3373_v7, %v2180_v31  ;;  %vm2230_vm6 = vweird.f32 %v3373_v7 }
 0x324   : > { %2490 = vmax.xlane.f32.xlu1 %v4843_v25  ;;  %3376 = vrsqrt.f32 %v4886_v9  ;;  %v2327_v35 = vsub.f32 1.5, %v2326_v19  ;;  %vm2220_vm7 = vweird.f32 %v4890_v16  ;;  %vm4921_vm10 = vmor %vm2229_vm5, %vm2230_vm6  ;;  %v4953_v19 = vmul.f32 0.5, %v1725_v60 }
 0x325   : > { %v1612_v15 = vsel %vm1611_vm2, %v3363_v42, %v1608_v61  ;;  %v2225_v42 = vmul.f32 %v3373_v7, %v2224_v34  ;;  %3378 = vrsqrt.f32 %v4888_v50  ;;  %vm4934_vm12 = vmor %vm2219_vm8, %vm2220_vm7  ;;  %vm2319_vm15 = vweird.f32 %v4886_v9 }
 0x326   : > { %v1736_v23 = vmul.f32 %v4723_v32, %v1612_v15  ;;  %v2234_v32 = vmul.f32 %v4879_v55, %v4855_v54  ;;  %v2156_v17 = vpop.xlane.xlu0 %2155  ;;  %vm2239_vm5 = vweird.f32 %v4855_v54  ;;  %vm2240_vm6 = vweird.f32 %v4879_v55 }
 0x327   : > { %v2226_v57 = vmul.f32 0.5, %v2225_v42  ;;  %v4987_v46 = vmax.f32 %v2156_v17, 1e-24  ;;  %vm1619_vm9 = vweird.f32 %v4913_v14 }
 0x328   : > { %v1816_v48 = vpop.f32.mrf.mxu0  ;;  %v1750_v58 = vpack.c.bf16 %v1736_v23, %v1735_v8  ;;  %v2235_v24 = vmul.f32 %v4879_v55, %v2234_v32 }
 0x329   : > { %v2388_v52 = vpop.f32.mrf.mxu1  ;;  %v1538_v48 = vpop.xlane.xlu2 %1537  ;;  %v2227_v39 = vsub.f32 1.5, %v2226_v57 }
 0x32a   : > { %1818 = vmatmul.bf16.gmra.mxu0 %v1750_v58  ;;  %v2214_v52 = vmul.f32 %v4890_v16, %v4868_v6  ;;  %v4903_v22 = vmax.f32 %v1538_v48, 1e-24  ;;  %v1536_v59 = vpop.xlane.xlu1 %1535  ;;  %v4908_v61 = vpop.eup %3376  ;;  %v4928_v58 = vmul.f32 0.5, %v2235_v24 }
 0x32b   : > { %v4911_v15 = vmax.f32 %v1536_v59, 1e-24  ;;  %v4915_v23 = vpop.eup %3378  ;;  %v2314_v20 = vmul.f32 %v4908_v61, %v4886_v9  ;;  %v2228_v49 = vmul.f32 %v3373_v7, %v2227_v39  ;;  %vm2320_vm0 = vweird.f32 %v4908_v61 }
 0x32c   : > { %v2215_v5 = vmul.f32 %v4890_v16, %v2214_v52  ;;  %3380 = vrsqrt.f32 %v4903_v22  ;;  %v1704_v31 = vmul.f32 %v4915_v23, %v4888_v50  ;;  %v2328_v52 = vmul.f32 %v4866_v21, %v2327_v35  ;;  %vm4996_vm3 = vmor %vm2319_vm15, %vm2320_vm0 }
 0x32d   : > { %3382 = vrsqrt.f32 %v4911_v15  ;;  %v2315_v34 = vmul.f32 %v4908_v61, %v2314_v20  ;;  %vm1710_vm2 = vweird.f32 %v4915_v23  ;;  %vm1629_vm8 = vweird.f32 %v4911_v15 }
 0x32e   : > { %v2216_v0 = vmul.f32 0.5, %v2215_v5  ;;  %3384 = vrsqrt.f32 %v4913_v14  ;;  %v1705_v45 = vmul.f32 %v4915_v23, %v1704_v31  ;;  %v2232_v5 = vsel %vm4921_vm10, %v3373_v7, %v2228_v49  ;;  %vm5010_vm4 = vmor %vm1709_vm1, %vm1710_vm2 }
 0x32f   : > { %v2316_v57 = vmul.f32 0.5, %v2315_v34  ;;  %v2356_v56 = vmul.f32 %v4730_v27, %v2232_v5  ;;  %v2332_v59 = vsel %vm4949_vm13, %v4866_v21, %v2328_v52  ;;  %v1727_v5 = vsub.f32 1.5, %v4953_v19  ;;  %v2174_v19 = vpop.xlane.xlu0 %2173  ;;  %vm5104_vm2 = vmor %vm2239_vm5, %vm2240_vm6 }
 0x330   : > { %v2217_v8 = vsub.f32 1.5, %v2216_v0  ;;  %v1698_v0 = vmul.f32 %v4863_v38, %v1697_v47  ;;  %v1706_v7 = vmul.f32 0.5, %v1705_v45  ;;  %v2366_v34 = vmul.f32 %v4567_v29, %v2332_v59 }
 0x331   : > { %v2160_v48 = vpop.xlane.xlu2 %2159  ;;  %v2317_v27 = vsub.f32 1.5, %v2316_v57 }
 0x332   : > { %v2218_v32 = vmul.f32 %v4890_v16, %v2217_v8  ;;  %v4955_v42 = vmax.f32 %v2160_v48, 1e-24  ;;  %v1554_v47 = vpop.xlane.xlu1 %1553  ;;  %v1707_v60 = vsub.f32 1.5, %v1706_v7  ;;  %v1702_v53 = vsel %vm4969_vm14, %v4863_v38, %v1698_v0 }
 0x333   : > { %v4985_v8 = vmax.f32 %v1554_v47, 1e-24  ;;  %v2318_v31 = vmul.f32 %v4908_v61, %v2317_v27  ;;  %v1745_v6 = vmul.f32 %v4557_v36, %v1702_v53 }
 0x334   : > { %v2222_v24 = vsel %vm4934_vm12, %v4890_v16, %v2218_v32  ;;  %v4976_v16 = vpop.eup %3380  ;;  %3386 = vrsqrt.f32 %v4955_v42  ;;  %v1708_v50 = vmul.f32 %v4915_v23, %v1707_v60  ;;  %v2237_v32 = vsub.f32 1.5, %v4928_v58 }
 0x335   : > { %v2355_v39 = vmul.f32 %v4732_v62, %v2222_v24  ;;  %v4983_v18 = vpop.eup %3382  ;;  %3388 = vrsqrt.f32 %v4985_v8  ;;  %v2322_v45 = vsel %vm4996_vm3, %v4908_v61, %v2318_v31  ;;  %vm1730_vm12 = vweird.f32 %v4883_v41 }
 0x336   : > { %v4989_v20 = vpop.eup %3384  ;;  %v1624_v21 = vmul.f32 %v4983_v18, %v4911_v15  ;;  %3390 = vrsqrt.f32 %v4987_v46  ;;  %v1712_v24 = vsel %vm5010_vm4, %v4915_v23, %v1708_v50  ;;  %vm1630_vm7 = vweird.f32 %v4983_v18  ;;  %vm5085_vm15 = vmor %vm1729_vm11, %vm1730_vm12 }
 0x337   : > { %v2370_v62 = vpack.c.bf16 %v2356_v56, %v2355_v39  ;;  %v1614_v9 = vmul.f32 %v4989_v20, %v4913_v14  ;;  %v2365_v56 = vmul.f32 %v4739_v63, %v2322_v45  ;;  %v1746_v36 = vmul.f32 %v4742_v30, %v1712_v24  ;;  %vm5055_vm13 = vmor %vm1629_vm8, %vm1630_vm7 }
 0x338   : > { %v1625_v38 = vmul.f32 %v4983_v18, %v1624_v21  ;;  %vm1620_vm10 = vweird.f32 %v4989_v20  ;;  %v5045_v39 = vmax.f32 %v2174_v19, 1e-24  ;;  %v1634_v60 = vmul.f32 %v4976_v16, %v4903_v22 }
 0x339   : > { %2390 = vmatmul.bf16.gmra.mxu1 %v2370_v62  ;;  %v1615_v52 = vmul.f32 %v4989_v20, %v1614_v9  ;;  %v2375_v35 = vpack.c.bf16 %v2366_v34, %v2365_v56  ;;  %v1755_v27 = vpack.c.bf16 %v1746_v36, %v1745_v6  ;;  %vm5070_vm14 = vmor %vm1619_vm9, %vm1620_vm10  ;;  %v1728_v31 = vmul.f32 %v4883_v41, %v1727_v5 }
 0x33a   : > { %v1626_v57 = vmul.f32 0.5, %v1625_v38  ;;  %v5037_v58 = vpop.eup %3386  ;;  %v2176_v61 = vpop.xlane.xlu1 %2175  ;;  %vm1719_vm0 = vweird.f32 %v4985_v8  ;;  %v2238_v38 = vmul.f32 %v4879_v55, %v2237_v32  ;;  %vm2249_vm3 = vweird.f32 %v4987_v46 }
 0x33b   : > { %v1616_v29 = vmul.f32 0.5, %v1615_v52  ;;  %v5041_v23 = vpop.eup %3388  ;;  %v5043_v7 = vmax.f32 %v2176_v61, 1e-24  ;;  %2415 = vmatmul.bf16.gmra.mxu3 %v2375_v35  ;;  %v2264_v62 = vmul.f32 %v5037_v58, %v4955_v42  ;;  %1843 = vmatmul.bf16.gmra.mxu2 %v1755_v27  ;;  %v1732_v54 = vsel %vm5085_vm15, %v4883_v41, %v1728_v31 }
 0x33c   : > { %v1627_v0 = vsub.f32 1.5, %v1626_v57  ;;  %v5047_v47 = vpop.eup %3390  ;;  %v1714_v17 = vmul.f32 %v5041_v23, %v4985_v8  ;;  %vm1720_vm1 = vweird.f32 %v5041_v23  ;;  %v2242_v19 = vsel %vm5104_vm2, %v4879_v55, %v2238_v38 }
 0x33d   : > { %v1617_v63 = vsub.f32 1.5, %v1616_v29  ;;  %v2244_v49 = vmul.f32 %v5047_v47, %v4987_v46  ;;  %3392 = vrsqrt.f32 %v5043_v7  ;;  %v2265_v32 = vmul.f32 %v5037_v58, %v2264_v62  ;;  %vm5120_vm5 = vmor %vm1719_vm0, %vm1720_vm1 }
 0x33e   : > { %v1628_v59 = vmul.f32 %v4983_v18, %v1627_v0  ;;  %v1715_v21 = vmul.f32 %v5041_v23, %v1714_v17  ;;  %3394 = vrsqrt.f32 %v5045_v39  ;;  %vm2250_vm4 = vweird.f32 %v5047_v47 }
 0x33f   : > { %v1618_v53 = vmul.f32 %v4989_v20, %v1617_v63  ;;  %v2245_v48 = vmul.f32 %v5047_v47, %v2244_v49  ;;  %v1748_v63 = vmul.f32 %v4587_v40, %v1732_v54  ;;  %v2266_v27 = vmul.f32 0.5, %v2265_v32  ;;  %vm5140_vm6 = vmor %vm2249_vm3, %vm2250_vm4 }
 0x340   : > { %v1632_v9 = vsel %vm5055_vm13, %v4983_v18, %v1628_v59  ;;  %v1716_v50 = vmul.f32 0.5, %v1715_v21  ;;  %v1635_v18 = vmul.f32 %v4976_v16, %v1634_v60  ;;  %v2357_v62 = vmul.f32 %v4577_v43, %v2242_v19 }
 0x341   : > { %v1622_v37 = vsel %vm5070_vm14, %v4989_v20, %v1618_v53  ;;  %v1738_v34 = vmul.f32 %v4751_v1, %v1632_v9  ;;  %v2246_v6 = vmul.f32 0.5, %v2245_v48  ;;  %v1540_v20 = vpop.xlane.xlu0 %1539  ;;  %vm2349_vm8 = vweird.f32 %v5043_v7 }
 0x342   : > { %v1737_v45 = vmul.f32 %v4753_v4, %v1622_v37  ;;  %v1717_v5 = vsub.f32 1.5, %v1716_v50  ;;  %v2158_v1 = vpop.xlane.xlu1 %2157  ;;  %v5126_v29 = vmax.f32 %v1540_v20, 1e-24  ;;  %v1636_v8 = vmul.f32 0.5, %v1635_v18 }
 0x343   : > { %v3393_v57 = vpop.eup %3392  ;;  %v2247_v4 = vsub.f32 1.5, %v2246_v6  ;;  %v5124_v56 = vmax.f32 %v2158_v1, 1e-24  ;;  %vm2339_vm9 = vweird.f32 %v5045_v39  ;;  %vm1639_vm11 = vweird.f32 %v4903_v22 }
 0x344   : > { %v1751_v36 = vpack.c.bf16 %v1738_v34, %v1737_v45  ;;  %v3395_v0 = vpop.eup %3394  ;;  %v2344_v61 = vmul.f32 %v3393_v57, %v5043_v7  ;;  %v1718_v41 = vmul.f32 %v5041_v23, %v1717_v5  ;;  %vm2350_vm7 = vweird.f32 %v3393_v57 }
 0x345   : > { %v2334_v35 = vmul.f32 %v3395_v0, %v5045_v39  ;;  %3396 = vrsqrt.f32 %v5124_v56  ;;  %v2248_v40 = vmul.f32 %v5047_v47, %v2247_v4  ;;  %vm2340_vm10 = vweird.f32 %v3395_v0  ;;  %vm5158_vm12 = vmor %vm2349_vm8, %vm2350_vm7 }
 0x346   : > { %1823 = vmatmul.bf16.gmra.mxu0 %v1751_v36  ;;  %v2345_v17 = vmul.f32 %v3393_v57, %v2344_v61  ;;  %3398 = vrsqrt.f32 %v5126_v29  ;;  %v1722_v55 = vsel %vm5120_vm5, %v5041_v23, %v1718_v41  ;;  %v1637_v21 = vsub.f32 1.5, %v1636_v8  ;;  %vm5165_vm14 = vmor %vm2339_vm9, %vm2340_vm10 }
 0x347   : > { %v2335_v59 = vmul.f32 %v3395_v0, %v2334_v35  ;;  %v1747_v60 = vmul.f32 %v4760_v44, %v1722_v55  ;;  %v2252_v23 = vsel %vm5140_vm6, %v5047_v47, %v2248_v40  ;;  %v2267_v43 = vsub.f32 1.5, %v2266_v27 }
 0x348   : > { %v2346_v15 = vmul.f32 0.5, %v2345_v17  ;;  %v2358_v44 = vmul.f32 %v4763_v26, %v2252_v23  ;;  %vm1640_vm13 = vweird.f32 %v4976_v16  ;;  %vm2269_vm15 = vweird.f32 %v4955_v42 }
 0x349   : > { %v2336_v46 = vmul.f32 0.5, %v2335_v59  ;;  %v1756_v49 = vpack.c.bf16 %v1748_v63, %v1747_v60  ;;  %vm2270_vm0 = vweird.f32 %v5037_v58  ;;  %v1638_v52 = vmul.f32 %v4976_v16, %v1637_v21  ;;  %vm5178_vm1 = vmor %vm1639_vm11, %vm1640_vm13  ;;  %v1382_v60 = vpop.permute.xlu2 %1381 }
 0x34a   : > { %v2347_v53 = vsub.f32 1.5, %v2346_v15  ;;  %v2371_v9 = vpack.c.bf16 %v2358_v44, %v2357_v62  ;;  %v2268_v45 = vmul.f32 %v5037_v58, %v2267_v43  ;;  %vm5186_vm2 = vmor %vm2269_vm15, %vm2270_vm0  ;;  %vm2259_vm3 = vweird.f32 %v5124_v56 }
 0x34b   : > { %v3397_v31 = vpop.eup %3396  ;;  %v2337_v14 = vsub.f32 1.5, %v2336_v46  ;;  %1848 = vmatmul.bf16.gmra.mxu2 %v1756_v49  ;;  %vm1649_vm5 = vweird.f32 %v5126_v29  ;;  %v1642_v24 = vsel %vm5178_vm1, %v4976_v16, %v1638_v52  ;;  %v3468_v15 = vmov 0.0  }
 0x34c   : > { %v3399_v48 = vpop.eup %3398  ;;  %v2254_v26 = vmul.f32 %v3397_v31, %v5124_v56  ;;  %v2348_v38 = vmul.f32 %v3393_v57, %v2347_v53  ;;  %2395 = vmatmul.bf16.gmra.mxu1 %v2371_v9  ;;  %vm2260_vm4 = vweird.f32 %v3397_v31  ;;  %v2272_v4 = vsel %vm5186_vm2, %v5037_v58, %v2268_v45 }
 0x34d   : > { %v1644_v50 = vmul.f32 %v3399_v48, %v5126_v29  ;;  %v2338_v37 = vmul.f32 %v3395_v0, %v2337_v14  ;;  %vm1650_vm6 = vweird.f32 %v3399_v48  ;;  %vm2261_vm8 = vmor %vm2259_vm3, %vm2260_vm4  ;;  %v1739_v36 = vmul.f32 %v4597_v28, %v1642_v24 }
 0x34e   : > { %v2255_v34 = vmul.f32 %v3397_v31, %v2254_v26  ;;  %v2352_v39 = vsel %vm5158_vm12, %v3393_v57, %v2348_v38  ;;  %vm1651_vm7 = vmor %vm1649_vm5, %vm1650_vm6  ;;  %vm2771_vm10 = vcmask 0  }
 0x34f   : > { %v1645_v42 = vmul.f32 %v3399_v48, %v1644_v50  ;;  %v2342_v32 = vsel %vm5165_vm14, %v3395_v0, %v2338_v37  ;;  %v2368_v6 = vmul.f32 %v4772_v11, %v2352_v39  ;;  %v2360_v0 = vmul.f32 %v4607_v51, %v2272_v4 }
 0x350   : > { %v2256_v1 = vmul.f32 0.5, %v2255_v34  ;;  %v2367_v22 = vmul.f32 %v4774_v33, %v2342_v32 }
 0x351   : > { %v1646_v20 = vmul.f32 0.5, %v1645_v42 }
 0x352   : > { %v2257_v54 = vsub.f32 1.5, %v2256_v1  ;;  %v2376_v57 = vpack.c.bf16 %v2368_v6, %v2367_v22 }
 0x353   : > { %v1647_v11 = vsub.f32 1.5, %v1646_v20 }
 0x354   : > { %2420 = vmatmul.bf16.gmra.mxu3 %v2376_v57  ;;  %v2258_v56 = vmul.f32 %v3397_v31, %v2257_v54 }
 0x355   : > { %v1648_v33 = vmul.f32 %v3399_v48, %v1647_v11  ;;  %v1834_v35 = vpop.f32.mrf.mxu2 }
 0x356   : > { %v2262_v29 = vsel %vm2261_vm8, %v3397_v31, %v2258_v56 }
 0x357   : > { %v1652_v61 = vsel %vm1651_vm7, %v3399_v48, %v1648_v33  ;;  %v2359_v41 = vmul.f32 %v4781_v10, %v2262_v29 }
 0x358   : > { %v1740_v19 = vmul.f32 %v4784_v12, %v1652_v61  ;;  %v3334_v12 = vld [vmem:[%s5225_s1] ss:$0 sm:$0xff] }
 0x359   : > { %v2372_v16 = vpack.c.bf16 %v2360_v0, %v2359_v41  ;;  %vm1429_vm9 = vcmp.eq.s32.totalorder %v1382_v60, %v3334_v12  ;;  %v2748_v41 = vld [vmem:[#allocation4] sm:$0x1] }
 0x35a   : > { %v1752_v8 = vpack.c.bf16 %v1740_v19, %v1739_v36 }
 0x35c   : > { %1828 = vmatmul.bf16.gmra.mxu0 %v1752_v8  ;;  %2400 = vmatmul.bf16.gmra.mxu1 %v2372_v16 }
 0x35d   : > { %v1836_v58 = vpop.f32.mrf.mxu2  ;;  %v2406_v55 = vpop.f32.mrf.mxu3 }
 0x365   : > { %v1839_v10 = vpop.f32.mrf.mxu2  ;;  %v2408_v40 = vpop.f32.mrf.mxu3 }
 0x396   : > { %v1922_v63 = vpop.xlane.xlu0 %1921 }
 0x397   : > { %v2491_v27 = vpop.xlane.xlu1 %2490  ;;  %v1953_v30 = vsub.f32 %v4838_v2, %v1922_v63  ;;  %v1841_v2 = vpop.f32.mrf.mxu2 }
 0x398   : > { %v2522_v28 = vsub.f32 %v4843_v25, %v2491_v27  ;;  %v2923_v25 = vsel %vm1429_vm9, 1.0, %v3468_v15 }
 0x399   : > { %v1969_v17 = vmul.f32 1.442695, %v1953_v30  ;;  %v1854_v46 = vmul.f32 %v2923_v25, %v4833_v3  ;;  %v2426_v49 = vmul.f32 %v2923_v25, %v4835_v13 }
 0x39a   : > { %v2538_v51 = vmul.f32 1.442695, %v2522_v28 }
 0x39b   : > { %3400 = vpow2.f32 %v1969_v17 }
 0x39c   : > { %3402 = vpow2.f32 %v2538_v51 }
 0x39d   : > { %v2411_v23 = vpop.f32.mrf.mxu3 }
 0x3a1   : > { %v3401_v59 = vpop.eup %3400 }
 0x3a2   : > { %v3403_v62 = vpop.eup %3402  ;;  %2001 = vadd.xlane.f32.xlu0 %v3401_v59 }
 0x3a3   : > { %2570 = vadd.xlane.f32.xlu1 %v3403_v62 }
 0x3a5   : > { %v2413_v21 = vpop.f32.mrf.mxu3 }
 0x3a7   : > { %v1819_v53 = vpop.f32.mrf.mxu0 }
 0x3aa   : > { %1870 = vadd.xlane.f32.xlu0 %v1854_v46 }
 0x3ab   : > { %2442 = vadd.xlane.f32.xlu1 %v2426_v49 }
 0x3af   : > { %v1821_v44 = vpop.f32.mrf.mxu0 }
 0x3b6   : > { %v2391_v31 = vpop.f32.mrf.mxu1 }
 0x3be   : > { %v2393_v43 = vpop.f32.mrf.mxu1  ;;  %v2416_v7 = vpop.f32.mrf.mxu3 }
 0x3bf   : > { %v1844_v14 = vpop.f32.mrf.mxu2 }
 0x3c3   : > { %v1824_v48 = vpop.f32.mrf.mxu0 }
 0x3c6   : > { %v2418_v47 = vpop.f32.mrf.mxu3 }
 0x3c7   : > { %v1846_v26 = vpop.f32.mrf.mxu2 }
 0x3c9   : > { %v2396_v38 = vpop.f32.mrf.mxu1 }
 0x3cb   : > { %v1826_v9 = vpop.f32.mrf.mxu0 }
 0x3cf   : > { %v1849_v50 = vpop.f32.mrf.mxu2 }
 0x3d1   : > { %v2398_v37 = vpop.f32.mrf.mxu1 }
 0x3d7   : > { %v2421_v3 = vpop.f32.mrf.mxu3  ;;  %v1851_v34 = vpop.f32.mrf.mxu2 }
 0x3d9   : > { %v1829_v13 = vpop.f32.mrf.mxu0  ;;  %v2401_v39 = vpop.f32.mrf.mxu1 }
 0x3df   : > { %v2423_v52 = vpop.f32.mrf.mxu3 }
 0x3e1   : > { %v1831_v18 = vpop.f32.mrf.mxu0  ;;  %v2403_v42 = vpop.f32.mrf.mxu1 }
 0x415   : > { %v2002_v32 = vpop.xlane.xlu0 %2001 }
 0x416   : > { %v2571_v6 = vpop.xlane.xlu1 %2570  ;;  %3404 = vlog2.f32 %v2002_v32 }
 0x417   : > { %3406 = vlog2.f32 %v2571_v6 }
 0x41c   : > { %v3405_v45 = vpop.eup %3404 }
 0x41d   : > { %v3407_v5 = vpop.eup %3406  ;;  %v2034_v1 = vmul.f32 0.6931472, %v3405_v45  ;;  %v1871_v57 = vpop.xlane.xlu0 %1870 }
 0x41e   : > { %v2603_v22 = vmul.f32 0.6931472, %v3407_v5  ;;  %v2443_v11 = vpop.xlane.xlu1 %2442 }
 0x41f   : > { %v2065_v20 = vadd.f32 %v2034_v1, %v1922_v63 }
 0x420   : > { %v2634_v54 = vadd.f32 %v2603_v22, %v2491_v27 }
 0x421   : > { %v2081_v24 = vsub.f32 %v2065_v20, %v1871_v57 }
 0x422   : > { %v2650_v4 = vsub.f32 %v2634_v54, %v2443_v11 }
 0x424   : > { %v2666_v56 = vadd.f32 %v2650_v4, %v2081_v24 }
 0x426   : > { %v2764_v33 = vrot.slane %v2666_v56, 4 }
 0x428   : > { %v2765_v36 = vadd.f32 %v2764_v33, %v2666_v56 }
 0x42a   : > { %v2766_v29 = vrot.slane %v2765_v36, 2 }
 0x42c   : > { %v2767_v0 = vadd.f32 %v2766_v29, %v2765_v36 }
 0x42e   : > { %v2768_v61 = vrot.slane %v2767_v0, 1 }
 0x430   : > { %v2769_v19 = vadd.f32 %v2768_v61, %v2767_v0 }
 0x432   : > { %v2770_v8 = vadd.f32 %v2769_v19, %v2748_v41 }
 0x434   : > { %2772 = vst.msk [vmem:[#allocation4] sm:$0x1] %vm2771_vm10, %v2770_v8 }
 0x43b   : > { %v2776_v16 = vld [vmem:[#allocation4] sm:$0x1] }
 0x43c   : > { %v2777_v35 = vmul.f32 0.0625, %v2776_v16 }
 0x43e   : > { %2778 = vst.msk [vmem:[#allocation5] sm:$0x1] %vm2771_vm10, %v2777_v35 }
 0x43f PF: > { %p3231_p7 = scmp.eq.s32.totalorder %s2881_s30, 1  ;;  %s2787_s25 = sshll.u32 %s5232_s8, 4  ;;  %s2788_s25 = int_to_ptr.hbm [resolvable:$true] %s2787_s25 }
 0x440   : > { %s3469_s26 = smov [#allocation5]  }
 0x441   : > { %s2785_s10 = sshll.u32 %s3469_s26, 4  ;;  %s2786_s10 = int_to_ptr.vmem [resolvable:$true] %s2785_s10 }
 0x442   : > { %3228 = dma.vmem_to_hbm [thread:$0]  (%p3231_p7), %s2786_s10, 16, %s2788_s25, [#allocation6]  }
 0x443   : > { %3449 = dma.done.wait (%p3231_p7), [#allocation6], 16  }
 0x444   : > { %3451 = vsyncadd (%p3231_p7), [#allocation6], 4294967280 }
 0x445 PF: > { %s19_s29 = sadd.s32 1, %s3462_s29   ;;  %s5340_s27 = smov %s3458_s28 }
 0x446   : > { %p16_p8 = scmp.ge.s32.totalorder %s19_s29, 4   ;;  %s5341_s28 = smov %s5343_s9 }
 0x448   :  { %18 = sbr.rel (!%p16_p8) target bundleno = 2 (0x2), region = 108 }
 0x44d   :  { %2801 = vsyncpa [#allocation6], 1 }
 0x44e   :  { %2803 = vsyncpa [#allocation6 + $0x1], 1 }

</bundles_post_ra>
